<compile_context>
chip_gen: v7x
topology: tpu7x:2x2x1
jax: 0.10.0
libtpu: 0.0.40
codegen_flags: <defaults>
</compile_context>

<pallas_src>
import jax
import jax.numpy as jnp
from jax.experimental import pallas as pl
from jax.experimental.pallas import tpu as pltpu


def _round_up(n: int, m: int) -> int:
    return ((n + m - 1) // m) * m


def _sublane_pack(dtype) -> int:
    """Rows per sublane tile for a dtype (f32 -> 8, bf16 -> 16, int8 -> 32)."""
    return max(8, 32 // jnp.dtype(dtype).itemsize)


def _tile2d_bytes(rows: int, cols: int, dtype) -> int:
    """VMEM footprint of a (rows, cols) tile after (sublane, lane) padding."""
    dt = jnp.dtype(dtype)
    return (_round_up(max(rows, 1), _sublane_pack(dt))
            * _round_up(max(cols, 1), 128) * dt.itemsize)


def _vmem_capacity_bytes() -> int:
    try:
        return int(pltpu.get_tpu_info().vmem_capacity_bytes)
    except Exception:
        return 64 << 20  # conservative per-core floor (v7x)


def _make_head_kernel(inv_hw: float, spatial_axis: int):
    """Fused: global average pool -> Linear -> ReLU -> Linear.

    x_ref : (TB, C, HW) if spatial_axis==2 (NCHW view, spatial on lanes)
            (TB, HW, C) if spatial_axis==1 (NHWC view, channels on lanes)
    w1_ref: (C, HID)      encoder_linear1 weight, stored as (in, out)
    b1_ref: (1, HID)
    w2_ref: (HID, Dpad)   encoder_linear2 weight, lane-padded to 128 multiple
    b2_ref: (1, Dpad)
    o_ref : (TB, Dpad)
    """

    def kernel(x_ref, w1_ref, b1_ref, w2_ref, b2_ref, o_ref):
        # AdaptiveAvgPool2d((1,1)) + view(B, -1): f32-accumulating sum over the
        # spatial axis (no materialized f32 upcast of the input tile), then a
        # cheap scalar rescale.
        feats = jnp.sum(x_ref[...], axis=spatial_axis,
                        dtype=jnp.float32) * inv_hw               # (TB, C)

        # encoder_linear1 + ReLU (MXU in the weight dtype, f32 accumulation).
        h = jnp.dot(feats.astype(w1_ref.dtype), w1_ref[...],
                    preferred_element_type=jnp.float32)
        h = jnp.maximum(h + b1_ref[...].astype(jnp.float32), 0.0)  # (TB, HID)

        # encoder_linear2.
        out = jnp.dot(h.astype(w2_ref.dtype), w2_ref[...],
                      preferred_element_type=jnp.float32)
        out = out + b2_ref[...].astype(jnp.float32)                # (TB, Dpad)

        o_ref[...] = out.astype(o_ref.dtype)

    return kernel


def encoder_forward(x, w1, b1, w2, b2, *, data_format="NCHW", batch_tile=None):
    """Post-trunk Encoder head.

    x : (B, C, H, W) if data_format=="NCHW" (PyTorch trunk layout)
        (B, H, W, C) if data_format=="NHWC" (only if the producer is already
        channels-last — no XLA transpose is ever inserted here).
    w1: (C, C//2), b1: (C//2,), w2: (C//2, D), b2: (D,) — PyTorch Linear
        weights stored pre-transposed as (in_features, out_features).
    """
    if data_format not in ("NCHW", "NHWC"):
        raise ValueError(f"unsupported data_format {data_format}")

    if data_format == "NCHW":
        B, C, H, W = x.shape
    else:
        B, H, W, C = x.shape
    HW = H * W
    HID = w1.shape[1]
    D = w2.shape[1]
    D_pad = _round_up(D, 128)

    x_dt = jnp.dtype(x.dtype)
    sub = _sublane_pack(x_dt)

    # Free views (no transpose, no extra HBM traffic).
    if data_format == "NCHW":
        x3 = x.reshape(B, C, HW)        # spatial on lanes, reduce axis 2
        spatial_axis = 2
        x_block = lambda tb: (tb, C, HW)
        x_row_bytes = _tile2d_bytes(C, HW, x_dt)
    else:
        x3 = x.reshape(B, HW, C)        # channels on lanes, reduce axis 1
        spatial_axis = 1
        x_block = lambda tb: (tb, HW, C)
        x_row_bytes = _tile2d_bytes(HW, C, x_dt)

    # Lane-dense output: pad the small w2/b2 once, slice the result afterwards.
    if D_pad != D:
        w2 = jnp.pad(w2, ((0, 0), (0, D_pad - D)))
        b2 = jnp.pad(b2, (0, D_pad - D))
    b1r = b1.reshape(1, HID)
    b2r = b2.reshape(1, D_pad)

    vmem_cap = _vmem_capacity_bytes()
    kernel = _make_head_kernel(1.0 / float(HW), spatial_axis)

    def run(single_buffer_weights: bool):
        # --- VMEM accounting with padded shapes -------------------------------
        wbuf = 1 if single_buffer_weights else 2
        w_resident = wbuf * (_tile2d_bytes(C, HID, w1.dtype)
                             + _tile2d_bytes(1, HID, b1r.dtype)
                             + _tile2d_bytes(HID, D_pad, w2.dtype)
                             + _tile2d_bytes(1, D_pad, b2r.dtype))
        # Per-batch-row cost: double-buffered x + out tiles, plus f32
        # intermediates (feats / h / out) the kernel keeps live.
        per_row = (2 * (x_row_bytes + D_pad * x_dt.itemsize)
                   + 4 * (_round_up(C, 128) + _round_up(HID, 128) + D_pad))
        reserve = 12 << 20                       # compiler internal scratch etc.
        usable = max(vmem_cap - reserve - w_resident, 1 << 20)
        tb_cap = max(sub, (usable // per_row // sub) * sub)

        # --- batch tile --------------------------------------------------------
        if batch_tile is not None:
            tb = max(1, min(batch_tile, B))
        else:
            # Keep >= ~4 grid steps when B allows it: pipelining + megacore.
            tb = min(tb_cap, _round_up(pl.cdiv(B, 4), sub), 1024)
            if tb >= 128:
                tb = (tb // 128) * 128           # 128-aligned rows when large
            if tb >= B:
                tb = B                           # tiny batch: single full tile
        grid = (pl.cdiv(B, tb),)

        need = tb * per_row + w_resident
        vmem_limit = int(min(max(need + (6 << 20), 32 << 20), vmem_cap))

        # --- specs -------------------------------------------------------------
        def resident(shape):
            idx = lambda i: (0,) * len(shape)
            if single_buffer_weights:
                return pl.BlockSpec(shape, idx, pipeline_mode=pl.Buffered(1))
            return pl.BlockSpec(shape, idx)

        cost = pl.CostEstimate(
            flops=int(2 * B * (C * HID + HID * D_pad) + B * C * HW),
            transcendentals=0,
            bytes_accessed=int(B * C * HW * x_dt.itemsize
                               + w_resident // wbuf
                               + B * D_pad * x_dt.itemsize),
        )

        return pl.pallas_call(
            kernel,
            out_shape=jax.ShapeDtypeStruct((B, D_pad), x_dt),
            grid=grid,
            in_specs=[
                pl.BlockSpec(x_block(tb), lambda i: (i, 0, 0)),  # x: batch-tiled
                resident((C, HID)),                              # w1: resident
                resident((1, HID)),                              # b1: resident
                resident((HID, D_pad)),                          # w2: resident
                resident((1, D_pad)),                            # b2: resident
            ],
            out_specs=pl.BlockSpec((tb, D_pad), lambda i: (i, 0)),
            compiler_params=pltpu.CompilerParams(
                dimension_semantics=("parallel",),               # 2 TCs on v7x
                vmem_limit_bytes=vmem_limit,
            ),
            cost_estimate=cost,
        )(x3, w1, b1r, w2, b2r)

    attempts = [True, False] if hasattr(pl, "Buffered") else [False]
    err = None
    out = None
    for sb in attempts:
        try:
            out = run(sb)
            err = None
            break
        except Exception as e:   # fall back to default double-buffered weights
            err = e
    if err is not None:
        raise err

    return out[:, :D] if D_pad != D else out


if __name__ == "__main__":
    key = jax.random.PRNGKey(0)
    # Small stand-in shapes: C plays the role of extractor_out_dim (2048 for
    # resnet152), hidden = C // 2 as in the module, output_dim is the decoder
    # embedding dim (deliberately NOT a multiple of 128 to exercise padding).
    B, C, H, W = 2, 256, 8, 8
    hidden = C // 2
    output_dim = 100

    k1, k2, k3, k4, k5, k6 = jax.random.split(key, 6)
    x = jax.random.normal(k1, (B, C, H, W), dtype=jnp.float32)
    # Deterministic synthetic parameters (PyTorch Linear semantics, weights
    # stored pre-transposed as (in_features, out_features)).
    w1 = jax.random.normal(k2, (C, hidden), dtype=jnp.float32) * 0.02
    b1 = jax.random.normal(k3, (hidden,), dtype=jnp.float32) * 0.02
    w2 = jax.random.normal(k4, (hidden, output_dim), dtype=jnp.float32) * 0.02
    b2 = jax.random.normal(k5, (output_dim,), dtype=jnp.float32) * 0.02

    # Pure-JAX reference of the same forward (avgpool -> flatten -> MLP head).
    def ref_fn(xn):
        feats = jnp.mean(xn, axis=(2, 3))
        return jnp.maximum(feats @ w1 + b1, 0.0) @ w2 + b2

    ref = ref_fn(x)

    # f32, NCHW.
    out = jax.block_until_ready(encoder_forward(x, w1, b1, w2, b2))
    assert out.shape == (B, output_dim), out.shape
    assert jnp.allclose(out, ref, atol=1e-4, rtol=1e-4), "f32 mismatch vs reference"

    # bf16, NCHW: x / weights stay bf16 through HBM/VMEM, accumulation is f32.
    out_bf16 = jax.block_until_ready(
        encoder_forward(
            x.astype(jnp.bfloat16),
            w1.astype(jnp.bfloat16), b1.astype(jnp.bfloat16),
            w2.astype(jnp.bfloat16), b2.astype(jnp.bfloat16)))
    assert out_bf16.shape == (B, output_dim), out_bf16.shape
    assert jnp.allclose(out_bf16.astype(jnp.float32), ref, atol=3e-2, rtol=1e-1), \
        "bf16 mismatch vs reference"

    # Larger batch: exercises the multi-step batch grid + ragged last tile.
    B_big = 20
    x_big = jax.random.normal(k6, (B_big, C, H, W), dtype=jnp.float32)
    ref_big = ref_fn(x_big)
    out_big = jax.block_until_ready(encoder_forward(x_big, w1, b1, w2, b2))
    assert out_big.shape == (B_big, output_dim), out_big.shape
    assert jnp.allclose(out_big, ref_big, atol=1e-4, rtol=1e-4), \
        "multi-tile f32 mismatch vs reference"

    # NHWC path (only used when the producer is already channels-last; the
    # transpose here is test-only to build such an input).
    x_nhwc = jnp.transpose(x, (0, 2, 3, 1))
    out_nhwc = jax.block_until_ready(
        encoder_forward(x_nhwc, w1, b1, w2, b2, data_format="NHWC"))
    assert out_nhwc.shape == (B, output_dim), out_nhwc.shape
    assert jnp.allclose(out_nhwc, ref, atol=1e-4, rtol=1e-4), \
        "NHWC mismatch vs reference"

    print("KERNEL_OK")
</pallas_src>

<mosaic_0001>
module attributes {stable_mosaic.version = 11 : i64} {
  func.func @kernel(%arg0: i32, %arg1: memref<2x256x64xf32, #tpu.memory_space<vmem>>, %arg2: memref<256x128xf32, #tpu.memory_space<vmem>>, %arg3: memref<1x128xf32, #tpu.memory_space<vmem>>, %arg4: memref<128x128xf32, #tpu.memory_space<vmem>>, %arg5: memref<1x128xf32, #tpu.memory_space<vmem>>, %arg6: memref<2x128xf32, #tpu.memory_space<vmem>>) attributes {dimension_semantics = [#tpu.dimension_semantics<parallel>], iteration_bounds = array<i64: 1>, scalar_prefetch = 0 : i64, scratch_operands = 0 : i64, tpu.core_type = #tpu.core_type<tc>, window_params = [{transform_indices = @transform_0, window_bounds = array<i64: 2, 256, 64>}, {pipeline_mode = #tpu.pipeline_mode<synchronous>, transform_indices = @transform_1, window_bounds = array<i64: 256, 128>}, {pipeline_mode = #tpu.pipeline_mode<synchronous>, transform_indices = @transform_2, window_bounds = array<i64: 1, 128>}, {pipeline_mode = #tpu.pipeline_mode<synchronous>, transform_indices = @transform_3, window_bounds = array<i64: 128, 128>}, {pipeline_mode = #tpu.pipeline_mode<synchronous>, transform_indices = @transform_4, window_bounds = array<i64: 1, 128>}, {transform_indices = @transform_5, window_bounds = array<i64: 2, 128>}]} {
    %c0 = arith.constant 0 : index
    %c0_0 = arith.constant 0 : index
    %c0_1 = arith.constant 0 : index
    %0 = vector.load %arg1[%c0, %c0_0, %c0_1] : memref<2x256x64xf32, #tpu.memory_space<vmem>>, vector<2x256x64xf32>
    %cst = arith.constant dense<0.000000e+00> : vector<2x256xf32>
    %1 = vector.multi_reduction <add>, %0, %cst [2] : vector<2x256x64xf32> to vector<2x256xf32>
    %cst_2 = arith.constant 1.562500e-02 : f32
    %2 = vector.broadcast %cst_2 : f32 to vector<2x256xf32>
    %3 = arith.mulf %1, %2 : vector<2x256xf32>
    %c0_3 = arith.constant 0 : index
    %c0_4 = arith.constant 0 : index
    %4 = vector.load %arg2[%c0_3, %c0_4] : memref<256x128xf32, #tpu.memory_space<vmem>>, vector<256x128xf32>
    %cst_5 = arith.constant dense<0.000000e+00> : vector<2x128xf32>
    %5 = tpu.matmul %3, %4, %cst_5 {dimension_numbers = #tpu.dot_dimension_numbers<[1], [0], [0], [1], [0, 0, 1, 1], [], []>} : vector<2x256xf32>, vector<256x128xf32>, vector<2x128xf32> -> vector<2x128xf32>
    %c0_6 = arith.constant 0 : index
    %c0_7 = arith.constant 0 : index
    %6 = vector.load %arg3[%c0_6, %c0_7] : memref<1x128xf32, #tpu.memory_space<vmem>>, vector<1x128xf32>
    %7 = vector.broadcast %6 : vector<1x128xf32> to vector<2x128xf32>
    %8 = arith.addf %5, %7 : vector<2x128xf32>
    %cst_8 = arith.constant 0.000000e+00 : f32
    %9 = vector.broadcast %cst_8 : f32 to vector<2x128xf32>
    %10 = arith.maximumf %8, %9 : vector<2x128xf32>
    %c0_9 = arith.constant 0 : index
    %c0_10 = arith.constant 0 : index
    %11 = vector.load %arg4[%c0_9, %c0_10] : memref<128x128xf32, #tpu.memory_space<vmem>>, vector<128x128xf32>
    %cst_11 = arith.constant dense<0.000000e+00> : vector<2x128xf32>
    %12 = tpu.matmul %10, %11, %cst_11 {dimension_numbers = #tpu.dot_dimension_numbers<[1], [0], [0], [1], [0, 0, 1, 1], [], []>} : vector<2x128xf32>, vector<128x128xf32>, vector<2x128xf32> -> vector<2x128xf32>
    %c0_12 = arith.constant 0 : index
    %c0_13 = arith.constant 0 : index
    %13 = vector.load %arg5[%c0_12, %c0_13] : memref<1x128xf32, #tpu.memory_space<vmem>>, vector<1x128xf32>
    %14 = vector.broadcast %13 : vector<1x128xf32> to vector<2x128xf32>
    %15 = arith.addf %12, %14 : vector<2x128xf32>
    %c0_14 = arith.constant 0 : index
    %c0_15 = arith.constant 0 : index
    %16 = vector.load %arg6[%c0_14, %c0_15] : memref<2x128xf32, #tpu.memory_space<vmem>>, vector<2x128xf32>
    tpu.vector_store %arg6[%c0_14, %c0_15], %15 {strides = array<i32>} : memref<2x128xf32, #tpu.memory_space<vmem>>, vector<2x128xf32>,
    return
  }
  func.func @transform_0(%arg0: i32) -> (i32, i32, i32) {
    %c0_i32 = arith.constant 0 : i32
    %c0_i32_0 = arith.constant 0 : i32
    %c0_i32_1 = arith.constant 0 : i32
    return %arg0, %c0_i32, %c0_i32_0 : i32, i32, i32
  }
  func.func @transform_1(%arg0: i32) -> (i32, i32) {
    %c0_i32 = arith.constant 0 : i32
    %c0_i32_0 = arith.constant 0 : i32
    %c0_i32_1 = arith.constant 0 : i32
    return %c0_i32, %c0_i32_0 : i32, i32
  }
  func.func @transform_2(%arg0: i32) -> (i32, i32) {
    %c0_i32 = arith.constant 0 : i32
    %c0_i32_0 = arith.constant 0 : i32
    %c0_i32_1 = arith.constant 0 : i32
    return %c0_i32, %c0_i32_0 : i32, i32
  }
  func.func @transform_3(%arg0: i32) -> (i32, i32) {
    %c0_i32 = arith.constant 0 : i32
    %c0_i32_0 = arith.constant 0 : i32
    %c0_i32_1 = arith.constant 0 : i32
    return %c0_i32, %c0_i32_0 : i32, i32
  }
  func.func @transform_4(%arg0: i32) -> (i32, i32) {
    %c0_i32 = arith.constant 0 : i32
    %c0_i32_0 = arith.constant 0 : i32
    %c0_i32_1 = arith.constant 0 : i32
    return %c0_i32, %c0_i32_0 : i32, i32
  }
  func.func @transform_5(%arg0: i32) -> (i32, i32) {
    %c0_i32 = arith.constant 0 : i32
    %c0_i32_0 = arith.constant 0 : i32
    return %arg0, %c0_i32 : i32, i32
  }
}

module attributes {stable_mosaic.version = 11 : i64} {
  func.func @kernel(%arg0: i32, %arg1: memref<2x256x64xf32, #tpu.memory_space<vmem>>, %arg2: memref<256x128xf32, #tpu.memory_space<vmem>>, %arg3: memref<1x128xf32, #tpu.memory_space<vmem>>, %arg4: memref<128x128xf32, #tpu.memory_space<vmem>>, %arg5: memref<1x128xf32, #tpu.memory_space<vmem>>, %arg6: memref<2x128xf32, #tpu.memory_space<vmem>>) attributes {dimension_semantics = [#tpu.dimension_semantics<parallel>], iteration_bounds = array<i64: 1>, scalar_prefetch = 0 : i64, scratch_operands = 0 : i64, tpu.core_type = #tpu.core_type<tc>, window_params = [{transform_indices = @transform_0, window_bounds = array<i64: 2, 256, 64>}, {pipeline_mode = #tpu.pipeline_mode<synchronous>, transform_indices = @transform_1, window_bounds = array<i64: 256, 128>}, {pipeline_mode = #tpu.pipeline_mode<synchronous>, transform_indices = @transform_2, window_bounds = array<i64: 1, 128>}, {pipeline_mode = #tpu.pipeline_mode<synchronous>, transform_indices = @transform_3, window_bounds = array<i64: 128, 128>}, {pipeline_mode = #tpu.pipeline_mode<synchronous>, transform_indices = @transform_4, window_bounds = array<i64: 1, 128>}, {transform_indices = @transform_5, window_bounds = array<i64: 2, 128>}]} {
    %c0 = arith.constant 0 : index
    %c0_0 = arith.constant 0 : index
    %c0_1 = arith.constant 0 : index
    %0 = vector.load %arg1[%c0, %c0_0, %c0_1] : memref<2x256x64xf32, #tpu.memory_space<vmem>>, vector<2x256x64xf32>
    %cst = arith.constant dense<0.000000e+00> : vector<2x256xf32>
    %1 = vector.multi_reduction <add>, %0, %cst [2] : vector<2x256x64xf32> to vector<2x256xf32>
    %cst_2 = arith.constant 1.562500e-02 : f32
    %2 = vector.broadcast %cst_2 : f32 to vector<2x256xf32>
    %3 = arith.mulf %1, %2 : vector<2x256xf32>
    %c0_3 = arith.constant 0 : index
    %c0_4 = arith.constant 0 : index
    %4 = vector.load %arg2[%c0_3, %c0_4] : memref<256x128xf32, #tpu.memory_space<vmem>>, vector<256x128xf32>
    %cst_5 = arith.constant dense<0.000000e+00> : vector<2x128xf32>
    %5 = tpu.matmul %3, %4, %cst_5 {dimension_numbers = #tpu.dot_dimension_numbers<[1], [0], [0], [1], [0, 0, 1, 1], [], []>} : vector<2x256xf32>, vector<256x128xf32>, vector<2x128xf32> -> vector<2x128xf32>
    %c0_6 = arith.constant 0 : index
    %c0_7 = arith.constant 0 : index
    %6 = vector.load %arg3[%c0_6, %c0_7] : memref<1x128xf32, #tpu.memory_space<vmem>>, vector<1x128xf32>
    %7 = vector.broadcast %6 : vector<1x128xf32> to vector<2x128xf32>
    %8 = arith.addf %5, %7 : vector<2x128xf32>
    %cst_8 = arith.constant 0.000000e+00 : f32
    %9 = vector.broadcast %cst_8 : f32 to vector<2x128xf32>
    %10 = arith.maximumf %8, %9 : vector<2x128xf32>
    %c0_9 = arith.constant 0 : index
    %c0_10 = arith.constant 0 : index
    %11 = vector.load %arg4[%c0_9, %c0_10] : memref<128x128xf32, #tpu.memory_space<vmem>>, vector<128x128xf32>
    %cst_11 = arith.constant dense<0.000000e+00> : vector<2x128xf32>
    %12 = tpu.matmul %10, %11, %cst_11 {dimension_numbers = #tpu.dot_dimension_numbers<[1], [0], [0], [1], [0, 0, 1, 1], [], []>} : vector<2x128xf32>, vector<128x128xf32>, vector<2x128xf32> -> vector<2x128xf32>
    %c0_12 = arith.constant 0 : index
    %c0_13 = arith.constant 0 : index
    %13 = vector.load %arg5[%c0_12, %c0_13] : memref<1x128xf32, #tpu.memory_space<vmem>>, vector<1x128xf32>
    %14 = vector.broadcast %13 : vector<1x128xf32> to vector<2x128xf32>
    %15 = arith.addf %12, %14 : vector<2x128xf32>
    %c0_14 = arith.constant 0 : index
    %c0_15 = arith.constant 0 : index
    %16 = vector.load %arg6[%c0_14, %c0_15] : memref<2x128xf32, #tpu.memory_space<vmem>>, vector<2x128xf32>
    tpu.vector_store %arg6[%c0_14, %c0_15], %15 {strides = array<i32>} : memref<2x128xf32, #tpu.memory_space<vmem>>, vector<2x128xf32>,
    return
  }
  func.func @transform_0(%arg0: i32) -> (i32, i32, i32) {
    %c0_i32 = arith.constant 0 : i32
    %c0_i32_0 = arith.constant 0 : i32
    %c0_i32_1 = arith.constant 0 : i32
    return %arg0, %c0_i32, %c0_i32_0 : i32, i32, i32
  }
  func.func @transform_1(%arg0: i32) -> (i32, i32) {
    %c0_i32 = arith.constant 0 : i32
    %c0_i32_0 = arith.constant 0 : i32
    %c0_i32_1 = arith.constant 0 : i32
    return %c0_i32, %c0_i32_0 : i32, i32
  }
  func.func @transform_2(%arg0: i32) -> (i32, i32) {
    %c0_i32 = arith.constant 0 : i32
    %c0_i32_0 = arith.constant 0 : i32
    %c0_i32_1 = arith.constant 0 : i32
    return %c0_i32, %c0_i32_0 : i32, i32
  }
  func.func @transform_3(%arg0: i32) -> (i32, i32) {
    %c0_i32 = arith.constant 0 : i32
    %c0_i32_0 = arith.constant 0 : i32
    %c0_i32_1 = arith.constant 0 : i32
    return %c0_i32, %c0_i32_0 : i32, i32
  }
  func.func @transform_4(%arg0: i32) -> (i32, i32) {
    %c0_i32 = arith.constant 0 : i32
    %c0_i32_0 = arith.constant 0 : i32
    %c0_i32_1 = arith.constant 0 : i32
    return %c0_i32, %c0_i32_0 : i32, i32
  }
  func.func @transform_5(%arg0: i32) -> (i32, i32) {
    %c0_i32 = arith.constant 0 : i32
    %c0_i32_0 = arith.constant 0 : i32
    return %arg0, %c0_i32 : i32, i32
  }
}

</mosaic_0001>

<bundles_post_ra>
// kernel: tpu_custom_call.1
= control target key start
LH: loop header
LB: loop body
LE: loop exit
PB: predicated region body
PF: predicated region fallthrough
CT: control target
= control target key end

     0   :  { %vm85_vm0 = vcmask 523264   ;;  %s1837_s0 = inlined_call_operand.vmem [shape: f32[2,256,64], index: 0, kind: input, shape index: {}]   ;;  %s1838_s1 = inlined_call_operand.vmem [shape: f32[256,128], index: 1, kind: input, shape index: {}]   ;;  %s1839_s2 = inlined_call_operand.vmem [shape: f32[1,128], index: 2, kind: input, shape index: {}]   ;;  %s1840_s3 = inlined_call_operand.vmem [shape: f32[128,128], index: 3, kind: input, shape index: {}]   ;;  %s1841_s4 = inlined_call_operand.vmem [shape: f32[1,128], index: 4, kind: input, shape index: {}]   ;;  %s1842_s5 = inlined_call_operand.hbm [shape: f32[2,128], index: 5, kind: output, shape index: {}]  }
   0x1   :  { %v69_v0 = vld [vmem:[%s1837_s0 + $0x180] sm:$0xff]  ;;  %v70_v2 = vld [vmem:[%s1837_s0 + $0x188] sm:$0xff]  ;;  %v39_v13 = vld [vmem:[%s1837_s0 + $0x90] sm:$0xff] }
   0x2   :  { %v37_v1 = vld [vmem:[%s1837_s0 + $0x80] sm:$0xff]  ;;  %v230_v3 = vsel %vm85_vm0, %v69_v0, 0.0  ;;  %v38_v5 = vld [vmem:[%s1837_s0 + $0x88] sm:$0xff]  ;;  %v233_v6 = vsel %vm85_vm0, %v70_v2, 0.0  ;;  %v140_v15 = vsel %vm85_vm0, %v39_v13, 0.0  ;;  %v71_v16 = vld [vmem:[%s1837_s0 + $0x190] sm:$0xff] }
   0x3   :  { %v134_v4 = vsel %vm85_vm0, %v37_v1, 0.0  ;;  %231 = vadd.xlane.f32.xlu1 %v230_v3  ;;  %v137_v7 = vsel %vm85_vm0, %v38_v5, 0.0  ;;  %v22_v8 = vld [vmem:[%s1837_s0 + $0x8] sm:$0xff]  ;;  %v21_v9 = vld [vmem:[%s1837_s0] sm:$0xff]  ;;  %v236_v18 = vsel %vm85_vm0, %v71_v16, 0.0  ;;  %v40_v20 = vld [vmem:[%s1837_s0 + $0x98] sm:$0xff] }
   0x4   :  { %135 = vadd.xlane.f32.xlu0 %v134_v4  ;;  %v89_v10 = vsel %vm85_vm0, %v22_v8, 0.0  ;;  %v86_v11 = vsel %vm85_vm0, %v21_v9, 0.0  ;;  %v53_v12 = vld [vmem:[%s1837_s0 + $0x100] sm:$0xff]  ;;  %v54_v17 = vld [vmem:[%s1837_s0 + $0x108] sm:$0xff]  ;;  %v23_v21 = vld [vmem:[%s1837_s0 + $0x10] sm:$0xff]  ;;  %v143_v22 = vsel %vm85_vm0, %v40_v20, 0.0 }
   0x5   :  { %v182_v14 = vsel %vm85_vm0, %v53_v12, 0.0  ;;  %v185_v19 = vsel %vm85_vm0, %v54_v17, 0.0  ;;  %v92_v23 = vsel %vm85_vm0, %v23_v21, 0.0  ;;  %v72_v24 = vld [vmem:[%s1837_s0 + $0x198] sm:$0xff]  ;;  %v55_v25 = vld [vmem:[%s1837_s0 + $0x110] sm:$0xff] }
   0x7   :  { %234 = vadd.xlane.f32.xlu1 %v233_v6 }
   0x8   :  { %138 = vadd.xlane.f32.xlu0 %v137_v7 }
   0xb   :  { %90 = vadd.xlane.f32.xlu1 %v89_v10 }
   0xc   :  { %87 = vadd.xlane.f32.xlu0 %v86_v11 }
   0xf   :  { %183 = vadd.xlane.f32.xlu1 %v182_v14 }
  0x10   :  { %141 = vadd.xlane.f32.xlu0 %v140_v15 }
  0x13   :  { %237 = vadd.xlane.f32.xlu1 %v236_v18 }
  0x14   :  { %186 = vadd.xlane.f32.xlu0 %v185_v19 }
  0x17   :  { %144 = vadd.xlane.f32.xlu1 %v143_v22 }
  0x18   :  { %93 = vadd.xlane.f32.xlu0 %v92_v23 }
  0x19   :  { %10 = vsyncpa [#allocation3], 0  ;;  %v239_v26 = vsel %vm85_vm0, %v72_v24, 0.0  ;;  %v188_v27 = vsel %vm85_vm0, %v55_v25, 0.0  ;;  %v41_v28 = vld [vmem:[%s1837_s0 + $0xa0] sm:$0xff]  ;;  %v24_v29 = vld [vmem:[%s1837_s0 + $0x18] sm:$0xff] }
  0x1a   :  { %v146_v30 = vsel %vm85_vm0, %v41_v28, 0.0  ;;  %v95_v31 = vsel %vm85_vm0, %v24_v29, 0.0  ;;  %v73_v32 = vld [vmem:[%s1837_s0 + $0x1a0] sm:$0xff]  ;;  %v56_v33 = vld [vmem:[%s1837_s0 + $0x118] sm:$0xff]  ;;  %v42_v36 = vld [vmem:[%s1837_s0 + $0xa8] sm:$0xff]  ;;  %vm456_vm1 = vcmask 130112  }
  0x1b   :  { %240 = vadd.xlane.f32.xlu1 %v239_v26  ;;  %v242_v34 = vsel %vm85_vm0, %v73_v32, 0.0  ;;  %v191_v35 = vsel %vm85_vm0, %v56_v33, 0.0  ;;  %v25_v37 = vld [vmem:[%s1837_s0 + $0x20] sm:$0xff]  ;;  %v149_v38 = vsel %vm85_vm0, %v42_v36, 0.0  ;;  %v74_v40 = vld [vmem:[%s1837_s0 + $0x1a8] sm:$0xff]  ;;  %v43_v44 = vld [vmem:[%s1837_s0 + $0xb0] sm:$0xff] }
  0x1c   :  { %189 = vadd.xlane.f32.xlu0 %v188_v27  ;;  %v98_v39 = vsel %vm85_vm0, %v25_v37, 0.0  ;;  %v57_v41 = vld [vmem:[%s1837_s0 + $0x120] sm:$0xff]  ;;  %v245_v42 = vsel %vm85_vm0, %v74_v40, 0.0  ;;  %v26_v45 = vld [vmem:[%s1837_s0 + $0x28] sm:$0xff]  ;;  %v152_v46 = vsel %vm85_vm0, %v43_v44, 0.0  ;;  %v75_v48 = vld [vmem:[%s1837_s0 + $0x1b0] sm:$0xff] }
  0x1d   :  { %v194_v43 = vsel %vm85_vm0, %v57_v41, 0.0  ;;  %v101_v47 = vsel %vm85_vm0, %v26_v45, 0.0  ;;  %v58_v49 = vld [vmem:[%s1837_s0 + $0x128] sm:$0xff]  ;;  %v248_v50 = vsel %vm85_vm0, %v75_v48, 0.0  ;;  %v44_v52 = vld [vmem:[%s1837_s0 + $0xb8] sm:$0xff]  ;;  %v27_v53 = vld [vmem:[%s1837_s0 + $0x30] sm:$0xff] }
  0x1e   :  { %v197_v51 = vsel %vm85_vm0, %v58_v49, 0.0  ;;  %v155_v54 = vsel %vm85_vm0, %v44_v52, 0.0  ;;  %v104_v55 = vsel %vm85_vm0, %v27_v53, 0.0  ;;  %v76_v56 = vld [vmem:[%s1837_s0 + $0x1b8] sm:$0xff]  ;;  %v59_v57 = vld [vmem:[%s1837_s0 + $0x130] sm:$0xff]  ;;  %v45_v60 = vld [vmem:[%s1837_s0 + $0xc0] sm:$0xff] }
  0x1f   :  { %147 = vadd.xlane.f32.xlu1 %v146_v30  ;;  %v251_v58 = vsel %vm85_vm0, %v76_v56, 0.0  ;;  %v200_v59 = vsel %vm85_vm0, %v59_v57, 0.0  ;;  %v28_v61 = vld [vmem:[%s1837_s0 + $0x38] sm:$0xff]  ;;  %v158_v62 = vsel %vm85_vm0, %v45_v60, 0.0  ;;  %v77_v0 = vld [vmem:[%s1837_s0 + $0x1c0] sm:$0xff]  ;;  %v46_v4 = vld [vmem:[%s1837_s0 + $0xc8] sm:$0xff] }
  0x20   :  { %96 = vadd.xlane.f32.xlu0 %v95_v31  ;;  %v107_v63 = vsel %vm85_vm0, %v28_v61, 0.0  ;;  %v60_v1 = vld [vmem:[%s1837_s0 + $0x138] sm:$0xff]  ;;  %v254_v2 = vsel %vm85_vm0, %v77_v0, 0.0  ;;  %v29_v5 = vld [vmem:[%s1837_s0 + $0x40] sm:$0xff]  ;;  %v161_v6 = vsel %vm85_vm0, %v46_v4, 0.0  ;;  %v78_v8 = vld [vmem:[%s1837_s0 + $0x1c8] sm:$0xff] }
  0x21   :  { %v203_v3 = vsel %vm85_vm0, %v60_v1, 0.0  ;;  %v110_v7 = vsel %vm85_vm0, %v29_v5, 0.0  ;;  %v61_v9 = vld [vmem:[%s1837_s0 + $0x140] sm:$0xff]  ;;  %v257_v10 = vsel %vm85_vm0, %v78_v8, 0.0  ;;  %v47_v12 = vld [vmem:[%s1837_s0 + $0xd0] sm:$0xff]  ;;  %v30_v13 = vld [vmem:[%s1837_s0 + $0x48] sm:$0xff] }
  0x22   :  { %v206_v11 = vsel %vm85_vm0, %v61_v9, 0.0  ;;  %v164_v14 = vsel %vm85_vm0, %v47_v12, 0.0  ;;  %v113_v15 = vsel %vm85_vm0, %v30_v13, 0.0  ;;  %v79_v16 = vld [vmem:[%s1837_s0 + $0x1d0] sm:$0xff]  ;;  %v62_v17 = vld [vmem:[%s1837_s0 + $0x148] sm:$0xff]  ;;  %v48_v20 = vld [vmem:[%s1837_s0 + $0xd8] sm:$0xff] }
  0x23   :  { %243 = vadd.xlane.f32.xlu1 %v242_v34  ;;  %v260_v18 = vsel %vm85_vm0, %v79_v16, 0.0  ;;  %v209_v19 = vsel %vm85_vm0, %v62_v17, 0.0  ;;  %v31_v21 = vld [vmem:[%s1837_s0 + $0x50] sm:$0xff]  ;;  %v167_v22 = vsel %vm85_vm0, %v48_v20, 0.0  ;;  %v80_v24 = vld [vmem:[%s1837_s0 + $0x1d8] sm:$0xff]  ;;  %v49_v28 = vld [vmem:[%s1837_s0 + $0xe0] sm:$0xff] }
  0x24   :  { %192 = vadd.xlane.f32.xlu0 %v191_v35  ;;  %v116_v23 = vsel %vm85_vm0, %v31_v21, 0.0  ;;  %v63_v25 = vld [vmem:[%s1837_s0 + $0x150] sm:$0xff]  ;;  %v263_v26 = vsel %vm85_vm0, %v80_v24, 0.0  ;;  %v32_v29 = vld [vmem:[%s1837_s0 + $0x58] sm:$0xff]  ;;  %v170_v30 = vsel %vm85_vm0, %v49_v28, 0.0  ;;  %v81_v32 = vld [vmem:[%s1837_s0 + $0x1e0] sm:$0xff] }
  0x25   :  { %v212_v27 = vsel %vm85_vm0, %v63_v25, 0.0  ;;  %v119_v31 = vsel %vm85_vm0, %v32_v29, 0.0  ;;  %v64_v33 = vld [vmem:[%s1837_s0 + $0x158] sm:$0xff]  ;;  %v266_v34 = vsel %vm85_vm0, %v81_v32, 0.0  ;;  %v50_v36 = vld [vmem:[%s1837_s0 + $0xe8] sm:$0xff]  ;;  %v33_v37 = vld [vmem:[%s1837_s0 + $0x60] sm:$0xff] }
  0x26   :  { %v215_v35 = vsel %vm85_vm0, %v64_v33, 0.0  ;;  %v82_v40 = vld [vmem:[%s1837_s0 + $0x1e8] sm:$0xff]  ;;  %v65_v41 = vld [vmem:[%s1837_s0 + $0x160] sm:$0xff]  ;;  %v51_v44 = vld [vmem:[%s1837_s0 + $0xf0] sm:$0xff]  ;;  %vm463_vm2 = vcmask 195712   ;;  %vm470_vm3 = vcmask 261312  }
  0x27   :  { %150 = vadd.xlane.f32.xlu1 %v149_v38  ;;  %v173_v38 = vsel %vm85_vm0, %v50_v36, 0.0  ;;  %v34_v45 = vld [vmem:[%s1837_s0 + $0x68] sm:$0xff]  ;;  %v83_v48 = vld [vmem:[%s1837_s0 + $0x1f0] sm:$0xff]  ;;  %v52_v52 = vld [vmem:[%s1837_s0 + $0xf8] sm:$0xff]  ;;  %vm477_vm4 = vcmask 326912   ;;  %vm484_vm5 = vcmask 392512  }
  0x28   :  { %99 = vadd.xlane.f32.xlu0 %v98_v39  ;;  %v122_v39 = vsel %vm85_vm0, %v33_v37, 0.0  ;;  %v66_v49 = vld [vmem:[%s1837_s0 + $0x168] sm:$0xff]  ;;  %v358_v53 = vld [vmem:[%s1838_s1 + $0x80] sm:$0xff]  ;;  %v179_v60 = vsel %vm85_vm0, %v52_v52, 0.0  ;;  %v361_v0 = vld [vmem:[%s1838_s1 + $0x98] sm:$0xff]  ;;  %vm491_vm6 = vcmask 458112  }
  0x29   :  { %v342_v57 = vld [vmem:[%s1838_s1] sm:$0xff]  ;;  %v67_v1 = vld [vmem:[%s1837_s0 + $0x170] sm:$0xff]  ;;  %v345_v4 = vld [vmem:[%s1838_s1 + $0x18] sm:$0xff]  ;;  %vm498_vm7 = vcmask 523712   ;;  %vm505_vm8 = vcmask 589312   ;;  %vm512_vm9 = vcmask 654912  }
  0x2a   :  { %v68_v8 = vld [vmem:[%s1837_s0 + $0x178] sm:$0xff]  ;;  %v362_v9 = vld [vmem:[%s1838_s1 + $0xa0] sm:$0xff]  ;;  %v348_v21 = vld [vmem:[%s1838_s1 + $0x30] sm:$0xff]  ;;  %vm519_vm10 = vcmask 720512   ;;  %vm526_vm11 = vcmask 786112   ;;  %vm533_vm12 = vcmask 851712  }
  0x2b   :  { %246 = vadd.xlane.f32.xlu1 %v245_v42  ;;  %v269_v42 = vsel %vm85_vm0, %v82_v40, 0.0  ;;  %v346_v13 = vld [vmem:[%s1838_s1 + $0x20] sm:$0xff]  ;;  %v227_v16 = vsel %vm85_vm0, %v68_v8, 0.0  ;;  %v367_v25 = vld [vmem:[%s1838_s1 + $0xc8] sm:$0xff]  ;;  %v352_v33 = vld [vmem:[%s1838_s1 + $0x50] sm:$0xff]  ;;  %vm540_vm13 = vcmask 917312  }
  0x2c   :  { %195 = vadd.xlane.f32.xlu0 %v194_v43  ;;  %v218_v43 = vsel %vm85_vm0, %v65_v41, 0.0  ;;  %v366_v24 = vld [vmem:[%s1838_s1 + $0xc0] sm:$0xff]  ;;  %v351_v28 = vld [vmem:[%s1838_s1 + $0x48] sm:$0xff]  ;;  %vm547_vm14 = vcmask 982912   ;;  %vm554_vm15 = vcmask 1048512  }
  0x2d   :  { %v370_v36 = vld [vmem:[%s1838_s1 + $0xe0] sm:$0xff]  ;;  %v371_v37 = vld [vmem:[%s1838_s1 + $0xe8] sm:$0xff] }
  0x2e   :  { %v354_v40 = vld [vmem:[%s1838_s1 + $0x60] sm:$0xff]  ;;  %v355_v41 = vld [vmem:[%s1838_s1 + $0x68] sm:$0xff] }
  0x2f   :  { %153 = vadd.xlane.f32.xlu1 %v152_v46  ;;  %v176_v46 = vsel %vm85_vm0, %v51_v44, 0.0  ;;  %v373_v44 = vld [vmem:[%s1838_s1 + $0xf8] sm:$0xff] }
  0x30   :  { %102 = vadd.xlane.f32.xlu0 %v101_v47  ;;  %v125_v47 = vsel %vm85_vm0, %v34_v45, 0.0 }
  0x33   :  { %249 = vadd.xlane.f32.xlu1 %v248_v50  ;;  %v272_v50 = vsel %vm85_vm0, %v83_v48, 0.0  ;;  %v357_v48 = vld [vmem:[%s1838_s1 + $0x78] sm:$0xff] }
  0x34   :  { %198 = vadd.xlane.f32.xlu0 %v197_v51  ;;  %v221_v51 = vsel %vm85_vm0, %v66_v49, 0.0 }
  0x37   :  { %156 = vadd.xlane.f32.xlu1 %v155_v54  ;;  %v359_v54 = vld [vmem:[%s1838_s1 + $0x88] sm:$0xff] }
  0x38   :  { %105 = vadd.xlane.f32.xlu0 %v104_v55  ;;  %v35_v55 = vld [vmem:[%s1837_s0 + $0x70] sm:$0xff]  ;;  %v1066_v56 = vpack.c.bf16 %v359_v54, %v358_v53 }
  0x39   :  { %v128_v61 = vsel %vm85_vm0, %v35_v55, 0.0 }
  0x3a   :  { %1067 = vmatprep.subr.bf16.mxu0 %v1066_v56 }
  0x3b   :  { %252 = vadd.xlane.f32.xlu1 %v251_v58  ;;  %v343_v58 = vld [vmem:[%s1838_s1 + $0x8] sm:$0xff] }
  0x3c   :  { %201 = vadd.xlane.f32.xlu0 %v200_v59  ;;  %v1068_v59 = vpack.c.bf16 %v343_v58, %v342_v57  ;;  %v869_v58 = vld [vmem:[%s1840_s3] sm:$0xff] }
  0x3e   :  { %1069 = vmatpush3.bf16.msra.mxu0 %v1068_v59  ;;  %v870_v59 = vld [vmem:[%s1840_s3 + $0x8] sm:$0xff] }
  0x3f   :  { %159 = vadd.xlane.f32.xlu1 %v158_v62  ;;  %v84_v62 = vld [vmem:[%s1837_s0 + $0x1f8] sm:$0xff] }
  0x40   :  { %108 = vadd.xlane.f32.xlu0 %v107_v63  ;;  %v360_v63 = vld [vmem:[%s1838_s1 + $0x90] sm:$0xff] }
  0x43   :  { %255 = vadd.xlane.f32.xlu1 %v254_v2  ;;  %v1070_v2 = vpack.c.bf16 %v361_v0, %v360_v63  ;;  %v1150_v63 = vmov 0.0|0.0   ;;  %v1099_v0 = vpack.c.bf16 %v870_v59, %v869_v58 }
  0x44   :  { %204 = vadd.xlane.f32.xlu0 %v203_v3  ;;  %v344_v3 = vld [vmem:[%s1838_s1 + $0x10] sm:$0xff]  ;;  %1098 = vmatprep.subr.bf16.mxu1 %v1150_v63 }
  0x45   :  { %v1072_v5 = vpack.c.bf16 %v345_v4, %v344_v3  ;;  %1071 = vmatprep.subr.bf16.mxu0 %v1070_v2  ;;  %1100 = vmatpush3.bf16.msra.mxu1 %v1099_v0 }
  0x46   :  { %1101 = vmatprep.subr.bf16.mxu1 %v1150_v63 }
  0x47   :  { %162 = vadd.xlane.f32.xlu1 %v161_v6  ;;  %v275_v6 = vsel %vm85_vm0, %v84_v62, 0.0  ;;  %1073 = vmatpush3.bf16.msra.mxu0 %v1072_v5 }
  0x48   :  { %111 = vadd.xlane.f32.xlu0 %v110_v7  ;;  %v224_v7 = vsel %vm85_vm0, %v67_v1, 0.0  ;;  %v872_v1 = vld [vmem:[%s1840_s3 + $0x18] sm:$0xff] }
  0x4b   :  { %258 = vadd.xlane.f32.xlu1 %v257_v10  ;;  %v363_v10 = vld [vmem:[%s1838_s1 + $0xa8] sm:$0xff] }
  0x4c   :  { %207 = vadd.xlane.f32.xlu0 %v206_v11  ;;  %v36_v11 = vld [vmem:[%s1837_s0 + $0x78] sm:$0xff]  ;;  %v1074_v12 = vpack.c.bf16 %v363_v10, %v362_v9  ;;  %v873_v10 = vld [vmem:[%s1840_s3 + $0x20] sm:$0xff] }
  0x4d   :  { %v131_v17 = vsel %vm85_vm0, %v36_v11, 0.0  ;;  %v874_v11 = vld [vmem:[%s1840_s3 + $0x28] sm:$0xff]  ;;  %vm793_vm0 = vcmask 1041409  }
  0x4e   :  { %1075 = vmatprep.subr.bf16.mxu0 %v1074_v12 }
  0x4f   :  { %165 = vadd.xlane.f32.xlu1 %v164_v14  ;;  %v347_v14 = vld [vmem:[%s1838_s1 + $0x28] sm:$0xff] }
  0x50   :  { %114 = vadd.xlane.f32.xlu0 %v113_v15  ;;  %v1076_v15 = vpack.c.bf16 %v347_v14, %v346_v13 }
  0x52   :  { %1077 = vmatpush3.bf16.msra.mxu0 %v1076_v15 }
  0x53   :  { %261 = vadd.xlane.f32.xlu1 %v260_v18  ;;  %v364_v18 = vld [vmem:[%s1838_s1 + $0xb0] sm:$0xff] }
  0x54   :  { %210 = vadd.xlane.f32.xlu0 %v209_v19  ;;  %v365_v19 = vld [vmem:[%s1838_s1 + $0xb8] sm:$0xff] }
  0x55   :  { %v1078_v20 = vpack.c.bf16 %v365_v19, %v364_v18  ;;  %v1105_v18 = vpack.c.bf16 %v874_v11, %v873_v10 }
  0x57   :  { %168 = vadd.xlane.f32.xlu1 %v167_v22  ;;  %v349_v22 = vld [vmem:[%s1838_s1 + $0x38] sm:$0xff]  ;;  %1079 = vmatprep.subr.bf16.mxu0 %v1078_v20 }
  0x58   :  { %117 = vadd.xlane.f32.xlu0 %v116_v23  ;;  %v1080_v23 = vpack.c.bf16 %v349_v22, %v348_v21  ;;  %v875_v22 = vld [vmem:[%s1840_s3 + $0x30] sm:$0xff] }
  0x5a   :  { %1081 = vmatpush3.bf16.msra.mxu0 %v1080_v23  ;;  %v876_v23 = vld [vmem:[%s1840_s3 + $0x38] sm:$0xff] }
  0x5b   :  { %264 = vadd.xlane.f32.xlu1 %v263_v26  ;;  %v1082_v26 = vpack.c.bf16 %v367_v25, %v366_v24 }
  0x5c   :  { %213 = vadd.xlane.f32.xlu0 %v212_v27  ;;  %v350_v27 = vld [vmem:[%s1838_s1 + $0x40] sm:$0xff] }
  0x5d   :  { %v1084_v29 = vpack.c.bf16 %v351_v28, %v350_v27  ;;  %1083 = vmatprep.subr.bf16.mxu0 %v1082_v26  ;;  %v1108_v28 = vpack.c.bf16 %v876_v23, %v875_v22 }
  0x5f   :  { %171 = vadd.xlane.f32.xlu1 %v170_v30  ;;  %v368_v30 = vld [vmem:[%s1838_s1 + $0xd0] sm:$0xff]  ;;  %1085 = vmatpush3.bf16.msra.mxu0 %v1084_v29 }
  0x60   :  { %120 = vadd.xlane.f32.xlu0 %v119_v31  ;;  %v369_v31 = vld [vmem:[%s1838_s1 + $0xd8] sm:$0xff] }
  0x61   :  { %v1086_v32 = vpack.c.bf16 %v369_v31, %v368_v30 }
  0x63   :  { %267 = vadd.xlane.f32.xlu1 %v266_v34  ;;  %v353_v34 = vld [vmem:[%s1838_s1 + $0x58] sm:$0xff]  ;;  %1087 = vmatprep.subr.bf16.mxu0 %v1086_v32  ;;  %v877_v32 = vld [vmem:[%s1840_s3 + $0x40] sm:$0xff] }
  0x64   :  { %216 = vadd.xlane.f32.xlu0 %v215_v35  ;;  %v1088_v35 = vpack.c.bf16 %v353_v34, %v352_v33  ;;  %v878_v33 = vld [vmem:[%s1840_s3 + $0x48] sm:$0xff] }
  0x66   :  { %1089 = vmatpush3.bf16.msra.mxu0 %v1088_v35 }
  0x67   :  { %174 = vadd.xlane.f32.xlu1 %v173_v38  ;;  %v445_v38 = vlaneseq }
  0x68   :  { %123 = vadd.xlane.f32.xlu0 %v122_v39  ;;  %v1090_v39 = vpack.c.bf16 %v371_v37, %v370_v36 }
  0x69   :  { %v1530_v45 = vand.u32 127, %v445_v38  ;;  %v1538_v49 = vshrl.u32 %v445_v38, 7 }
  0x6a   :  { %1091 = vmatprep.subr.bf16.mxu0 %v1090_v39  ;;  %v1111_v39 = vpack.c.bf16 %v878_v33, %v877_v32 }
  0x6b   :  { %270 = vadd.xlane.f32.xlu1 %v269_v42  ;;  %v1092_v42 = vpack.c.bf16 %v355_v41, %v354_v40  ;;  %v1543_v54 = vsub.s32 %v1530_v45, %v1538_v49  ;;  %v458_v4 = vadd.s32 4294967280, %v1530_v45  ;;  %v465_v31 = vadd.s32 4294967272, %v1530_v45 }
  0x6c   :  { %219 = vadd.xlane.f32.xlu0 %v218_v43  ;;  %v372_v43 = vld [vmem:[%s1838_s1 + $0xf0] sm:$0xff] }
  0x6d   :  { %1093 = vmatpush3.bf16.msra.mxu0 %v1092_v42  ;;  %v461_v21 = vsub.s32 %v458_v4, %v1538_v49 }
  0x6f   :  { %177 = vadd.xlane.f32.xlu1 %v176_v46  ;;  %v1094_v46 = vpack.c.bf16 %v373_v44, %v372_v43  ;;  %v468_v43 = vsub.s32 %v465_v31, %v1538_v49  ;;  %v879_v44 = vld [vmem:[%s1840_s3 + $0x50] sm:$0xff] }
  0x70   :  { %126 = vadd.xlane.f32.xlu0 %v125_v47  ;;  %v356_v47 = vld [vmem:[%s1838_s1 + $0x70] sm:$0xff] }
  0x71   :  { %1095 = vmatprep.subr.bf16.mxu0 %v1094_v46  ;;  %v880_v46 = vld [vmem:[%s1840_s3 + $0x58] sm:$0xff] }
  0x73   :  { %273 = vadd.xlane.f32.xlu1 %v272_v50  ;;  %v1096_v50 = vpack.c.bf16 %v357_v48, %v356_v47 }
  0x74   :  { %222 = vadd.xlane.f32.xlu0 %v221_v51  ;;  %v451_v51 = vadd.s32 4294967288, %v1530_v45 }
  0x75   :  { %1097 = vmatpush3.bf16.msra.mxu0 %v1096_v50 }
  0x76   :  { %v1546_v57 = vsub.s32 %v451_v51, %v1538_v49 }
  0x77   :  { %180 = vadd.xlane.f32.xlu1 %v179_v60  ;;  %v871_v60 = vld [vmem:[%s1840_s3 + $0x10] sm:$0xff] }
  0x78   :  { %129 = vadd.xlane.f32.xlu0 %v128_v61  ;;  %v1102_v5 = vpack.c.bf16 %v872_v1, %v871_v60 }
  0x7a   :  { %1103 = vmatpush3.bf16.msra.mxu1 %v1102_v5 }
  0x7b   :  { %276 = vadd.xlane.f32.xlu1 %v275_v6  ;;  %1104 = vmatprep.subr.bf16.mxu1 %v1150_v63 }
  0x7c   :  { %225 = vadd.xlane.f32.xlu0 %v224_v7 }
  0x7e   :  { %1106 = vmatpush3.bf16.msra.mxu1 %v1105_v18 }
  0x7f   :  { %228 = vadd.xlane.f32.xlu1 %v227_v16  ;;  %1107 = vmatprep.subr.bf16.mxu1 %v1150_v63 }
  0x80   :  { %132 = vadd.xlane.f32.xlu0 %v131_v17 }
  0x82   :  { %1109 = vmatpush3.bf16.msra.mxu1 %v1108_v28 }
  0x83   :  { %1110 = vmatprep.subr.bf16.mxu1 %v1150_v63 }
  0x86   :  { %1112 = vmatpush3.bf16.msra.mxu1 %v1111_v39 }
  0x87   :  { %1113 = vmatprep.subr.bf16.mxu1 %v1150_v63 }
  0x90   :  { %v232_v52 = vpop.xlane.xlu1 %231 }
  0x91   :  { %v136_v53 = vpop.xlane.xlu0 %135  ;;  %v326_v55 = vmul.f32 0.015625, %v232_v52 }
  0x92   :  { %v294_v56 = vmul.f32 0.015625, %v136_v53 }
  0x93   :  { %v717_v6 = vrot.slane %v326_v55, %v1543_v54 }
  0x94   :  { %v235_v61 = vpop.xlane.xlu1 %234  ;;  %v559_v7 = vrot.slane %v294_v56, %v1543_v54 }
  0x95   :  { %v139_v62 = vpop.xlane.xlu0 %138  ;;  %v327_v2 = vmul.f32 0.015625, %v235_v61 }
  0x96   :  { %v295_v3 = vmul.f32 0.015625, %v139_v62 }
  0x97   :  { %v721_v8 = vrot.slane %v327_v2, %v1546_v57 }
  0x98   :  { %v563_v9 = vrot.slane %v295_v3, %v1546_v57  ;;  %v91_v12 = vpop.xlane.xlu1 %90 }
  0x99   :  { %v88_v13 = vpop.xlane.xlu0 %87  ;;  %v722_v14 = vsel %vm456_vm1, %v721_v8, %v717_v6  ;;  %v279_v16 = vmul.f32 0.015625, %v91_v12  ;;  %v479_v12 = vadd.s32 4294967256, %v1530_v45 }
  0x9a   :  { %v564_v15 = vsel %vm456_vm1, %v563_v9, %v559_v7  ;;  %v278_v17 = vmul.f32 0.015625, %v88_v13 }
  0x9b   :  { %v455_v19 = vrot.slane %v279_v16, %v1546_v57 }
  0x9c   :  { %v450_v20 = vrot.slane %v278_v17, %v1543_v54  ;;  %v184_v24 = vpop.xlane.xlu1 %183 }
  0x9d   :  { %v142_v25 = vpop.xlane.xlu0 %141  ;;  %v310_v29 = vmul.f32 0.015625, %v184_v24 }
  0x9e   :  { %v457_v26 = vsel %vm456_vm1, %v455_v19, %v450_v20  ;;  %v296_v27 = vmul.f32 0.015625, %v142_v25 }
  0x9f   :  { %v638_v40 = vrot.slane %v310_v29, %v1543_v54  ;;  %v1114_v54 = vpack.c.bf16 %v880_v46, %v879_v44 }
  0xa0   :  { %v568_v30 = vrot.slane %v296_v27, %v461_v21  ;;  %v238_v34 = vpop.xlane.xlu1 %237 }
  0xa1   :  { %v187_v35 = vpop.xlane.xlu0 %186  ;;  %v328_v37 = vmul.f32 0.015625, %v238_v34  ;;  %1115 = vmatpush3.bf16.msra.mxu1 %v1114_v54 }
  0xa2   :  { %v569_v36 = vsel %vm463_vm2, %v568_v30, %v564_v15  ;;  %v311_v38 = vmul.f32 0.015625, %v187_v35  ;;  %1116 = vmatprep.subr.bf16.mxu1 %v1150_v63  ;;  %v486_v30 = vadd.s32 4294967248, %v1530_v45 }
  0xa3   :  { %v726_v41 = vrot.slane %v328_v37, %v461_v21 }
  0xa4   :  { %v642_v42 = vrot.slane %v311_v38, %v1546_v57  ;;  %v145_v47 = vpop.xlane.xlu1 %144  ;;  %v472_v57 = vadd.s32 4294967264, %v1530_v45  ;;  %v1625_v39 = vsub.s32 %v486_v30, %v1538_v49 }
  0xa5   :  { %v94_v48 = vpop.xlane.xlu0 %93  ;;  %v727_v50 = vsel %vm463_vm2, %v726_v41, %v722_v14  ;;  %v297_v52 = vmul.f32 0.015625, %v145_v47 }
  0xa6   :  { %v643_v51 = vsel %vm456_vm1, %v642_v42, %v638_v40  ;;  %v280_v53 = vmul.f32 0.015625, %v94_v48  ;;  %v475_v3 = vsub.s32 %v472_v57, %v1538_v49  ;;  %vm1151_vm1 = vmmov 0  }
  0xa7   :  { %v573_v55 = vrot.slane %v297_v52, %v468_v43 }
  0xa8   :  { %v462_v56 = vrot.slane %v280_v53, %v461_v21  ;;  %v241_v58 = vpop.xlane.xlu1 %240 }
  0xa9   :  { %v190_v59 = vpop.xlane.xlu0 %189  ;;  %v574_v60 = vsel %vm470_vm3, %v573_v55, %v569_v36  ;;  %v329_v62 = vmul.f32 0.015625, %v241_v58 }
  0xaa   :  { %v464_v61 = vsel %vm463_vm2, %v462_v56, %v457_v26  ;;  %v312_v0 = vmul.f32 0.015625, %v190_v59 }
  0xab   :  { %v731_v1 = vrot.slane %v329_v62, %v468_v43 }
  0xac   :  { %v647_v2 = vrot.slane %v312_v0, %v461_v21  ;;  %v148_v4 = vpop.xlane.xlu1 %147  ;;  %v482_v21 = vsub.s32 %v479_v12, %v1538_v49 }
  0xad   :  { %v97_v5 = vpop.xlane.xlu0 %96  ;;  %v732_v6 = vsel %vm470_vm3, %v731_v1, %v727_v50  ;;  %v298_v8 = vmul.f32 0.015625, %v148_v4 }
  0xae   :  { %v648_v7 = vsel %vm463_vm2, %v647_v2, %v643_v51  ;;  %v281_v9 = vmul.f32 0.015625, %v97_v5 }
  0xaf   :  { %v578_v10 = vrot.slane %v298_v8, %v475_v3 }
  0xb0   :  { %v469_v11 = vrot.slane %v281_v9, %v468_v43  ;;  %v244_v13 = vpop.xlane.xlu1 %243 }
  0xb1   :  { %v193_v14 = vpop.xlane.xlu0 %192  ;;  %v579_v15 = vsel %vm477_vm4, %v578_v10, %v574_v60  ;;  %v330_v17 = vmul.f32 0.015625, %v244_v13 }
  0xb2   :  { %v471_v16 = vsel %vm470_vm3, %v469_v11, %v464_v61  ;;  %v313_v18 = vmul.f32 0.015625, %v193_v14  ;;  %v493_v14 = vadd.s32 4294967240, %v1530_v45 }
  0xb3   :  { %v736_v19 = vrot.slane %v330_v17, %v475_v3  ;;  %v500_v17 = vadd.s32 4294967232, %v1530_v45 }
  0xb4   :  { %v652_v20 = vrot.slane %v313_v18, %v468_v43  ;;  %v151_v22 = vpop.xlane.xlu1 %150  ;;  %v507_v18 = vadd.s32 4294967224, %v1530_v45 }
  0xb5   :  { %v100_v23 = vpop.xlane.xlu0 %99  ;;  %v737_v24 = vsel %vm477_vm4, %v736_v19, %v732_v6  ;;  %v299_v26 = vmul.f32 0.015625, %v151_v22  ;;  %v514_v22 = vadd.s32 4294967216, %v1530_v45  ;;  %v1675_v30 = vsub.s32 %v500_v17, %v1538_v49 }
  0xb6   :  { %v653_v25 = vsel %vm470_vm3, %v652_v20, %v648_v7  ;;  %v282_v27 = vmul.f32 0.015625, %v100_v23  ;;  %v1665_v20 = vsub.s32 %v493_v14, %v1538_v49 }
  0xb7   :  { %v583_v28 = vrot.slane %v299_v26, %v482_v21 }
  0xb8   :  { %v476_v29 = vrot.slane %v282_v27, %v475_v3  ;;  %v247_v31 = vpop.xlane.xlu1 %246 }
  0xb9   :  { %v196_v32 = vpop.xlane.xlu0 %195  ;;  %v584_v33 = vsel %vm484_vm5, %v583_v28, %v579_v15  ;;  %v331_v35 = vmul.f32 0.015625, %v247_v31  ;;  %v535_v31 = vadd.s32 4294967192, %v1530_v45 }
  0xba   :  { %v478_v34 = vsel %vm477_vm4, %v476_v29, %v471_v16  ;;  %v314_v36 = vmul.f32 0.015625, %v196_v32  ;;  %v1679_v32 = vsub.s32 %v507_v18, %v1538_v49 }
  0xbb   :  { %v741_v37 = vrot.slane %v331_v35, %v482_v21 }
  0xbc   :  { %v657_v38 = vrot.slane %v314_v36, %v475_v3  ;;  %v154_v40 = vpop.xlane.xlu1 %153 }
  0xbd   :  { %v103_v41 = vpop.xlane.xlu0 %102  ;;  %v1628_v42 = vsel %vm484_vm5, %v741_v37, %v737_v24  ;;  %v300_v44 = vmul.f32 0.015625, %v154_v40  ;;  %v521_v24 = vadd.s32 4294967208, %v1530_v45 }
  0xbe   :  { %v658_v43 = vsel %vm477_vm4, %v657_v38, %v653_v25  ;;  %v283_v46 = vmul.f32 0.015625, %v103_v41  ;;  %v528_v25 = vadd.s32 4294967200, %v1530_v45  ;;  %v1686_v38 = vsub.s32 %v514_v22, %v1538_v49 }
  0xbf   :  { %v588_v47 = vrot.slane %v300_v44, %v1625_v39 }
  0xc0   :  { %v483_v48 = vrot.slane %v283_v46, %v482_v21  ;;  %v250_v50 = vpop.xlane.xlu1 %249  ;;  %v1693_v44 = vsub.s32 %v528_v25, %v1538_v49 }
  0xc1   :  { %v199_v51 = vpop.xlane.xlu0 %198  ;;  %v1633_v52 = vsel %vm491_vm6, %v588_v47, %v584_v33  ;;  %v332_v19 = vmul.f32 0.015625, %v250_v50  ;;  %v542_v33 = vadd.s32 4294967184, %v1530_v45 }
  0xc2   :  { %v1636_v53 = vsel %vm484_vm5, %v483_v48, %v478_v34  ;;  %v315_v54 = vmul.f32 0.015625, %v199_v51  ;;  %v549_v34 = vadd.s32 4294967176, %v1530_v45  ;;  %v1702_v51 = vsub.s32 %v535_v31, %v1538_v49 }
  0xc3   :  { %v746_v35 = vrot.slane %v332_v19, %v1625_v39 }
  0xc4   :  { %v662_v55 = vrot.slane %v315_v54, %v482_v21  ;;  %v157_v56 = vpop.xlane.xlu1 %156 }
  0xc5   :  { %v106_v57 = vpop.xlane.xlu0 %105  ;;  %v301_v21 = vmul.f32 0.015625, %v157_v56  ;;  %v1705_v56 = vsub.s32 %v542_v33, %v1538_v49 }
  0xc6   :  { %v1639_v58 = vsel %vm484_vm5, %v662_v55, %v658_v43  ;;  %v284_v23 = vmul.f32 0.015625, %v106_v57  ;;  %v1690_v43 = vsub.s32 %v521_v24, %v1538_v49  ;;  %v1708_v57 = vsub.s32 %v549_v34, %v1538_v49 }
  0xc7   :  { %v593_v36 = vrot.slane %v301_v21, %v1665_v20 }
  0xc8   :  { %v253_v59 = vpop.xlane.xlu1 %252  ;;  %v490_v40 = vrot.slane %v284_v23, %v1625_v39 }
  0xc9   :  { %v202_v60 = vpop.xlane.xlu0 %201  ;;  %v333_v28 = vmul.f32 0.015625, %v253_v59  ;;  %v747_v59 = vsel %vm491_vm6, %v746_v35, %v1628_v42 }
  0xca   :  { %v316_v29 = vmul.f32 0.015625, %v202_v60  ;;  %v594_v60 = vsel %vm498_vm7, %v593_v36, %v1633_v52 }
  0xcb   :  { %v751_v47 = vrot.slane %v333_v28, %v1665_v20 }
  0xcc   :  { %v160_v61 = vpop.xlane.xlu1 %159  ;;  %v667_v48 = vrot.slane %v316_v29, %v1625_v39 }
  0xcd   :  { %v109_v62 = vpop.xlane.xlu0 %108  ;;  %v302_v37 = vmul.f32 0.015625, %v160_v61  ;;  %v752_v17 = vsel %vm498_vm7, %v751_v47, %v747_v59 }
  0xce   :  { %v285_v41 = vmul.f32 0.015625, %v109_v62  ;;  %v492_v62 = vsel %vm491_vm6, %v490_v40, %v1636_v53  ;;  %v668_v42 = vsel %vm491_vm6, %v667_v48, %v1639_v58 }
  0xcf   :  { %v598_v39 = vrot.slane %v302_v37, %v1675_v30 }
  0xd0   :  { %v256_v0 = vpop.xlane.xlu1 %255 }
  0xd1   :  { %v205_v1 = vpop.xlane.xlu0 %204  ;;  %v334_v50 = vmul.f32 0.015625, %v256_v0  ;;  %v497_v0 = vrot.slane %v285_v41, %v1665_v20  ;;  %v599_v19 = vsel %vm505_vm8, %v598_v39, %v594_v60 }
  0xd2   :  { %v317_v54 = vmul.f32 0.015625, %v205_v1 }
  0xd3   :  { %v756_v52 = vrot.slane %v334_v50, %v1675_v30  ;;  %v499_v23 = vsel %vm498_vm7, %v497_v0, %v492_v62 }
  0xd4   :  { %v163_v2 = vpop.xlane.xlu1 %162  ;;  %v672_v18 = vrot.slane %v317_v54, %v1665_v20 }
  0xd5   :  { %v112_v3 = vpop.xlane.xlu0 %111  ;;  %v303_v55 = vmul.f32 0.015625, %v163_v2 }
  0xd6   :  { %v286_v61 = vmul.f32 0.015625, %v112_v3 }
  0xd7   :  { %v603_v53 = vrot.slane %v303_v55, %v1679_v32 }
  0xd8   :  { %v259_v4 = vpop.xlane.xlu1 %258  ;;  %v504_v21 = vrot.slane %v286_v61, %v1675_v30 }
  0xd9   :  { %v208_v5 = vpop.xlane.xlu0 %207  ;;  %v335_v1 = vmul.f32 0.015625, %v259_v4  ;;  %v604_v31 = vsel %vm512_vm9, %v603_v53, %v599_v19 }
  0xda   :  { %v318_v2 = vmul.f32 0.015625, %v208_v5 }
  0xdc   :  { %v1641_v6 = vpop.xlane.xlu1 %165  ;;  %v677_v20 = vrot.slane %v318_v2, %v1675_v30 }
  0xdd   :  { %v1643_v7 = vpop.xlane.xlu0 %114  ;;  %v304_v3 = vmul.f32 0.015625, %v1641_v6  ;;  %v761_v6 = vrot.slane %v335_v1, %v1679_v32 }
  0xde   :  { %v287_v4 = vmul.f32 0.015625, %v1643_v7 }
  0xdf   :  { %v608_v28 = vrot.slane %v304_v3, %v1686_v38 }
  0xe0   :  { %v1645_v8 = vpop.xlane.xlu1 %261  ;;  %v511_v33 = vrot.slane %v287_v4, %v1679_v32 }
  0xe1   :  { %v1647_v9 = vpop.xlane.xlu0 %210  ;;  %v336_v5 = vmul.f32 0.015625, %v1645_v8  ;;  %v757_v8 = vsel %vm505_vm8, %v756_v52, %v752_v17  ;;  %v609_v48 = vsel %vm519_vm10, %v608_v28, %v604_v31 }
  0xe2   :  { %v319_v22 = vmul.f32 0.015625, %v1647_v9 }
  0xe3   :  { %v766_v30 = vrot.slane %v336_v5, %v1686_v38 }
  0xe4   :  { %v1649_v10 = vpop.xlane.xlu1 %168  ;;  %v682_v34 = vrot.slane %v319_v22, %v1679_v32 }
  0xe5   :  { %v1651_v11 = vpop.xlane.xlu0 %117  ;;  %v305_v58 = vmul.f32 0.015625, %v1649_v10  ;;  %v673_v10 = vsel %vm498_vm7, %v672_v18, %v668_v42 }
  0xe6   :  { %v288_v24 = vmul.f32 0.015625, %v1651_v11  ;;  %v506_v11 = vsel %vm505_vm8, %v504_v21, %v499_v23 }
  0xe7   :  { %v613_v35 = vrot.slane %v305_v58, %v1690_v43 }
  0xe8   :  { %v1653_v12 = vpop.xlane.xlu1 %264  ;;  %v518_v37 = vrot.slane %v288_v24, %v1686_v38 }
  0xe9   :  { %v1655_v13 = vpop.xlane.xlu0 %213  ;;  %v337_v29 = vmul.f32 0.015625, %v1653_v12  ;;  %v762_v12 = vsel %vm512_vm9, %v761_v6, %v757_v8  ;;  %v614_v39 = vsel %vm526_vm11, %v613_v35, %v609_v48 }
  0xea   :  { %v320_v9 = vmul.f32 0.015625, %v1655_v13  ;;  %v678_v13 = vsel %vm505_vm8, %v677_v20, %v673_v10  ;;  %v767_v55 = vsel %vm519_vm10, %v766_v30, %v762_v12 }
  0xeb   :  { %v771_v50 = vrot.slane %v337_v29, %v1690_v43 }
  0xec   :  { %v1658_v15 = vpop.xlane.xlu1 %171  ;;  %v687_v32 = vrot.slane %v320_v9, %v1686_v38 }
  0xed   :  { %v1660_v16 = vpop.xlane.xlu0 %120  ;;  %v306_v36 = vmul.f32 0.015625, %v1658_v15  ;;  %v513_v15 = vsel %vm512_vm9, %v511_v33, %v506_v11 }
  0xee   :  { %v289_v40 = vmul.f32 0.015625, %v1660_v16  ;;  %v683_v16 = vsel %vm512_vm9, %v682_v34, %v678_v13 }
  0xef   :  { %v618_v61 = vrot.slane %v306_v36, %v1693_v44 }
  0xf0   :  { %v1670_v26 = vpop.xlane.xlu1 %267  ;;  %v525_v38 = vrot.slane %v289_v40, %v1690_v43 }
  0xf1   :  { %v1672_v27 = vpop.xlane.xlu0 %216  ;;  %v338_v54 = vmul.f32 0.015625, %v1670_v26  ;;  %v520_v26 = vsel %vm519_vm10, %v518_v37, %v513_v15  ;;  %v619_v4 = vsel %vm533_vm12, %v618_v61, %v614_v39  ;;  %v883_v61 = vld [vmem:[%s1840_s3 + $0x70] sm:$0xff] }
  0xf2   :  { %v321_v59 = vmul.f32 0.015625, %v1672_v27  ;;  %v772_v27 = vsel %vm526_vm11, %v771_v50, %v767_v55  ;;  %v527_v22 = vsel %vm526_vm11, %v525_v38, %v520_v26  ;;  %v1152_v38 = vmov 0.0  }
  0xf3   :  { %v776_v42 = vrot.slane %v338_v54, %v1693_v44  ;;  %1063 = vmatprep.mubr.msk.f32.mxu1 %vm1151_vm1, %v1152_v38 }
  0xf4   :  { %v1695_v46 = vpop.xlane.xlu1 %174  ;;  %v692_v3 = vrot.slane %v321_v59, %v1690_v43 }
  0xf5   :  { %v1697_v45 = vpop.xlane.xlu0 %123  ;;  %v307_v60 = vmul.f32 0.015625, %v1695_v46  ;;  %v688_v46 = vsel %vm519_vm10, %v687_v32, %v683_v16  ;;  %v777_v24 = vsel %vm533_vm12, %v776_v42, %v772_v27  ;;  %v881_v16 = vld [vmem:[%s1840_s3 + $0x60] sm:$0xff] }
  0xf6   :  { %v290_v18 = vmul.f32 0.015625, %v1697_v45  ;;  %v693_v8 = vsel %vm526_vm11, %v692_v3, %v688_v46  ;;  %v978_v46 = vld [vmem:[%s1841_s4] ss:$0 sm:$0xff] }
  0xf8   :  { %v271_v14 = vpop.xlane.xlu1 %270 }
  0xf9   :  { %v1718_v49 = vpop.xlane.xlu0 %219  ;;  %v339_v62 = vmul.f32 0.015625, %v271_v14  ;;  %v623_v14 = vrot.slane %v307_v60, %v1702_v51 }
  0xfa   :  { %v322_v53 = vmul.f32 0.015625, %v1718_v49 }
  0xfb   :  { %v781_v5 = vrot.slane %v339_v62, %v1702_v51  ;;  %v624_v29 = vsel %vm540_vm13, %v623_v14, %v619_v4  ;;  %v884_v62 = vld [vmem:[%s1840_s3 + $0x78] sm:$0xff] }
  0xfc   :  { %v178_v7 = vpop.xlane.xlu1 %177  ;;  %v697_v28 = vrot.slane %v322_v53, %v1693_v44  ;;  %v1120_v26 = vpack.c.bf16 %v884_v62, %v883_v61 }
  0xfd   :  { %v127_v25 = vpop.xlane.xlu0 %126  ;;  %v308_v0 = vmul.f32 0.015625, %v178_v7  ;;  %v782_v33 = vsel %vm540_vm13, %v781_v5, %v777_v24 }
  0xfe   :  { %v291_v19 = vmul.f32 0.015625, %v127_v25  ;;  %v532_v25 = vrot.slane %v290_v18, %v1693_v44 }
  0xff   :  { %v628_v58 = vrot.slane %v308_v0, %v1705_v56 }
 0x100   :  { %v274_v41 = vpop.xlane.xlu1 %273  ;;  %v539_v9 = vrot.slane %v291_v19, %v1702_v51  ;;  %v534_v40 = vsel %vm533_vm12, %v532_v25, %v527_v22 }
 0x101   :  { %v223_v47 = vpop.xlane.xlu0 %222  ;;  %v340_v1 = vmul.f32 0.015625, %v274_v41  ;;  %v629_v36 = vsel %vm547_vm14, %v628_v58, %v624_v29  ;;  %v698_v41 = vsel %vm533_vm12, %v697_v28, %v693_v8 }
 0x102   :  { %v323_v21 = vmul.f32 0.015625, %v223_v47 }
 0x103   :  { %v786_v23 = vrot.slane %v340_v1, %v1705_v56  ;;  %v977_v1 = vld [vmem:[%s1839_s2] ss:$0 sm:$0xff] }
 0x104   :  { %v181_v2 = vpop.xlane.xlu1 %180  ;;  %v702_v10 = vrot.slane %v323_v21, %v1702_v51 }
 0x105   :  { %v130_v17 = vpop.xlane.xlu0 %129  ;;  %v309_v52 = vmul.f32 0.015625, %v181_v2  ;;  %v787_v44 = vsel %vm547_vm14, %v786_v23, %v782_v33 }
 0x106   :  { %v292_v6 = vmul.f32 0.015625, %v130_v17  ;;  %v703_v48 = vsel %vm540_vm13, %v702_v10, %v698_v41 }
 0x107   :  { %v633_v45 = vrot.slane %v309_v52, %v1708_v57 }
 0x108   :  { %v277_v43 = vpop.xlane.xlu1 %276  ;;  %v546_v30 = vrot.slane %v292_v6, %v1705_v56 }
 0x109   :  { %v226_v20 = vpop.xlane.xlu0 %225  ;;  %v341_v49 = vmul.f32 0.015625, %v277_v43  ;;  %v634_v37 = vsel %vm554_vm15, %v633_v45, %v629_v36 }
 0x10a   :  { %v324_v7 = vmul.f32 0.015625, %v226_v20 }
 0x10b   :  { %v791_v31 = vrot.slane %v341_v49, %v1708_v57 }
 0x10c   :  { %v707_v11 = vrot.slane %v324_v7, %v1705_v56  ;;  %v229_v34 = vpop.xlane.xlu1 %228  ;;  %v541_v56 = vsel %vm540_vm13, %v539_v9, %v534_v40 }
 0x10d   :  { %v133_v35 = vpop.xlane.xlu0 %132  ;;  %v325_v12 = vmul.f32 0.015625, %v229_v34  ;;  %v792_v51 = vsel %vm554_vm15, %v791_v31, %v787_v44  ;;  %v548_v54 = vsel %vm547_vm14, %v546_v30, %v541_v56 }
 0x10e   :  { %v293_v13 = vmul.f32 0.015625, %v133_v35  ;;  %v795_v47 = vsel %vm793_vm0, %v792_v51, %v634_v37  ;;  %v708_v15 = vsel %vm547_vm14, %v707_v11, %v703_v48 }
 0x10f   :  { %v712_v50 = vrot.slane %v325_v12, %v1708_v57  ;;  %862 = vmatprep.mubr.f32.mxu0 %v795_v47 }
 0x110   :  { %v553_v32 = vrot.slane %v293_v13, %v1708_v57  ;;  %v882_v57 = vld [vmem:[%s1840_s3 + $0x68] sm:$0xff]  ;;  %s1153_s3 = smov [#allocation2]  }
 0x111   :  { %v713_v59 = vsel %vm554_vm15, %v712_v50, %v708_v15  ;;  %v1117_v39 = vpack.c.bf16 %v882_v57, %v881_v16  ;;  %s969_s16 = sshll.u32 %s1153_s3, 4  ;;  %s970_s16 = int_to_ptr.vmem [resolvable:$true] %s969_s16 }
 0x112   :  { %v555_v55 = vsel %vm554_vm15, %v553_v32, %v548_v54  ;;  %s1126_s17 = scalar_lea.vmem %s970_s16, 32  ;;  %p1131_p1 = scmp.lt.s32.totalorder %s970_s16, %s970_s16 }
 0x113   :  { %v794_v60 = vsel %vm793_vm0, %v713_v59, %v555_v55  ;;  %1118 = vmatpush3.bf16.msra.mxu1 %v1117_v39  ;;  %p1127_p0 = scmp.ne.s32.totalorder %s970_s16, %s1126_s17  ;;  %p1132_p2 = scmp.lt.s32.totalorder %s1126_s17, %s1126_s17 }
 0x114   :  { %863 = vmatmul.mubr.f32.vlgmr.msra.gmra.mrb[0].mxu0 %v794_v60  ;;  %1119 = vmatprep.subr.bf16.mxu1 %v1150_v63 }
 0x115   :  { %p1133_p3 = por %p1132_p2, %p1131_p1 }
 0x117   :  { %1121 = vmatpush3.bf16.msra.mxu1 %v1120_v26  ;;  %p1134_p4 = pnand %p1133_p3, %p1127_p0 }
 0x1e7   :  { %v1011_v0 = vpop.f32.mrb[0].mxu0 }
 0x1e8   :  { %v1012_v2 = vpop.f32.mrb[1].mxu0 }
 0x1e9   :  { %v1013_v63 = vadd.f32 %v1012_v2, %v1011_v0 }
 0x1eb   :  { %v865_v17 = vadd.f32 %v1013_v63, %v977_v1 }
 0x1ed   :  { %v868_v27 = vmax.f32 %v865_v17, 0.0 }
 0x1ef   :  { %1064 = vmatmul.mubr.f32.vlgmr.msra.gmra.mrb[0].mxu1 %v868_v27 }
 0x2c2   :  { %v958_v42 = vpop.f32.mrb[0].mxu1 }
 0x2c3   :  { %v959_v52 = vadd.f32 %v978_v46, %v958_v42  ;;  %v1065_v3 = vpop.f32.mrb[1].mxu1 }
 0x2c5   :  { %962 = vst [vmem:[#allocation2] sm:$0x3] %v959_v52 }
 0x2c6   :  { %1137 = shalt.err (!%p1134_p4)
}
 0x2c7   :  { %s1138_s19 = scalar_lea.hbm %s1842_s5, 32 }
 0x2c8   :  { %p1139_p5 = scmp.ne.s32.totalorder %s1842_s5, %s1138_s19  ;;  %p1142_p6 = scmp.lt.u32.totalorder %s1138_s19, %s1842_s5 }
 0x2ca   :  { %p1144_p7 = pnand %p1142_p6, %p1139_p5 }
 0x2cc   :  { %1147 = shalt.err (!%p1144_p7)
}
 0x2cd   :  { %972 = dma.vmem_to_hbm [thread:$0]  %s970_s16, 32, %s1842_s5, [#allocation3]  }
 0x2ce   :  { %1148 = dma.done.wait [#allocation3], 32  }
 0x2cf   :  { %1149 = vsyncadd [#allocation3], 4294967264 }
 0x2d0   :  { %976 = vsyncpa [#allocation3], 1 }

// kernel: tpu_custom_call.1
= control target key start
LH: loop header
LB: loop body
LE: loop exit
PB: predicated region body
PF: predicated region fallthrough
CT: control target
= control target key end

     0   :  { %vm85_vm0 = vcmask 523264   ;;  %s1837_s0 = inlined_call_operand.vmem [shape: f32[2,256,64], index: 0, kind: input, shape index: {}]   ;;  %s1838_s1 = inlined_call_operand.vmem [shape: f32[256,128], index: 1, kind: input, shape index: {}]   ;;  %s1839_s2 = inlined_call_operand.vmem [shape: f32[1,128], index: 2, kind: input, shape index: {}]   ;;  %s1840_s3 = inlined_call_operand.vmem [shape: f32[128,128], index: 3, kind: input, shape index: {}]   ;;  %s1841_s4 = inlined_call_operand.vmem [shape: f32[1,128], index: 4, kind: input, shape index: {}]   ;;  %s1842_s5 = inlined_call_operand.hbm [shape: f32[2,128], index: 5, kind: output, shape index: {}]  }
   0x1   :  { %v69_v0 = vld [vmem:[%s1837_s0 + $0x180] sm:$0xff]  ;;  %v70_v2 = vld [vmem:[%s1837_s0 + $0x188] sm:$0xff]  ;;  %v39_v13 = vld [vmem:[%s1837_s0 + $0x90] sm:$0xff] }
   0x2   :  { %v37_v1 = vld [vmem:[%s1837_s0 + $0x80] sm:$0xff]  ;;  %v230_v3 = vsel %vm85_vm0, %v69_v0, 0.0  ;;  %v38_v5 = vld [vmem:[%s1837_s0 + $0x88] sm:$0xff]  ;;  %v233_v6 = vsel %vm85_vm0, %v70_v2, 0.0  ;;  %v140_v15 = vsel %vm85_vm0, %v39_v13, 0.0  ;;  %v71_v16 = vld [vmem:[%s1837_s0 + $0x190] sm:$0xff] }
   0x3   :  { %v134_v4 = vsel %vm85_vm0, %v37_v1, 0.0  ;;  %231 = vadd.xlane.f32.xlu1 %v230_v3  ;;  %v137_v7 = vsel %vm85_vm0, %v38_v5, 0.0  ;;  %v22_v8 = vld [vmem:[%s1837_s0 + $0x8] sm:$0xff]  ;;  %v21_v9 = vld [vmem:[%s1837_s0] sm:$0xff]  ;;  %v236_v18 = vsel %vm85_vm0, %v71_v16, 0.0  ;;  %v40_v20 = vld [vmem:[%s1837_s0 + $0x98] sm:$0xff] }
   0x4   :  { %135 = vadd.xlane.f32.xlu0 %v134_v4  ;;  %v89_v10 = vsel %vm85_vm0, %v22_v8, 0.0  ;;  %v86_v11 = vsel %vm85_vm0, %v21_v9, 0.0  ;;  %v53_v12 = vld [vmem:[%s1837_s0 + $0x100] sm:$0xff]  ;;  %v54_v17 = vld [vmem:[%s1837_s0 + $0x108] sm:$0xff]  ;;  %v23_v21 = vld [vmem:[%s1837_s0 + $0x10] sm:$0xff]  ;;  %v143_v22 = vsel %vm85_vm0, %v40_v20, 0.0 }
   0x5   :  { %v182_v14 = vsel %vm85_vm0, %v53_v12, 0.0  ;;  %v185_v19 = vsel %vm85_vm0, %v54_v17, 0.0  ;;  %v92_v23 = vsel %vm85_vm0, %v23_v21, 0.0  ;;  %v72_v24 = vld [vmem:[%s1837_s0 + $0x198] sm:$0xff]  ;;  %v55_v25 = vld [vmem:[%s1837_s0 + $0x110] sm:$0xff] }
   0x7   :  { %234 = vadd.xlane.f32.xlu1 %v233_v6 }
   0x8   :  { %138 = vadd.xlane.f32.xlu0 %v137_v7 }
   0xb   :  { %90 = vadd.xlane.f32.xlu1 %v89_v10 }
   0xc   :  { %87 = vadd.xlane.f32.xlu0 %v86_v11 }
   0xf   :  { %183 = vadd.xlane.f32.xlu1 %v182_v14 }
  0x10   :  { %141 = vadd.xlane.f32.xlu0 %v140_v15 }
  0x13   :  { %237 = vadd.xlane.f32.xlu1 %v236_v18 }
  0x14   :  { %186 = vadd.xlane.f32.xlu0 %v185_v19 }
  0x17   :  { %144 = vadd.xlane.f32.xlu1 %v143_v22 }
  0x18   :  { %93 = vadd.xlane.f32.xlu0 %v92_v23 }
  0x19   :  { %10 = vsyncpa [#allocation3], 0  ;;  %v239_v26 = vsel %vm85_vm0, %v72_v24, 0.0  ;;  %v188_v27 = vsel %vm85_vm0, %v55_v25, 0.0  ;;  %v41_v28 = vld [vmem:[%s1837_s0 + $0xa0] sm:$0xff]  ;;  %v24_v29 = vld [vmem:[%s1837_s0 + $0x18] sm:$0xff] }
  0x1a   :  { %v146_v30 = vsel %vm85_vm0, %v41_v28, 0.0  ;;  %v95_v31 = vsel %vm85_vm0, %v24_v29, 0.0  ;;  %v73_v32 = vld [vmem:[%s1837_s0 + $0x1a0] sm:$0xff]  ;;  %v56_v33 = vld [vmem:[%s1837_s0 + $0x118] sm:$0xff]  ;;  %v42_v36 = vld [vmem:[%s1837_s0 + $0xa8] sm:$0xff]  ;;  %vm456_vm1 = vcmask 130112  }
  0x1b   :  { %240 = vadd.xlane.f32.xlu1 %v239_v26  ;;  %v242_v34 = vsel %vm85_vm0, %v73_v32, 0.0  ;;  %v191_v35 = vsel %vm85_vm0, %v56_v33, 0.0  ;;  %v25_v37 = vld [vmem:[%s1837_s0 + $0x20] sm:$0xff]  ;;  %v149_v38 = vsel %vm85_vm0, %v42_v36, 0.0  ;;  %v74_v40 = vld [vmem:[%s1837_s0 + $0x1a8] sm:$0xff]  ;;  %v43_v44 = vld [vmem:[%s1837_s0 + $0xb0] sm:$0xff] }
  0x1c   :  { %189 = vadd.xlane.f32.xlu0 %v188_v27  ;;  %v98_v39 = vsel %vm85_vm0, %v25_v37, 0.0  ;;  %v57_v41 = vld [vmem:[%s1837_s0 + $0x120] sm:$0xff]  ;;  %v245_v42 = vsel %vm85_vm0, %v74_v40, 0.0  ;;  %v26_v45 = vld [vmem:[%s1837_s0 + $0x28] sm:$0xff]  ;;  %v152_v46 = vsel %vm85_vm0, %v43_v44, 0.0  ;;  %v75_v48 = vld [vmem:[%s1837_s0 + $0x1b0] sm:$0xff] }
  0x1d   :  { %v194_v43 = vsel %vm85_vm0, %v57_v41, 0.0  ;;  %v101_v47 = vsel %vm85_vm0, %v26_v45, 0.0  ;;  %v58_v49 = vld [vmem:[%s1837_s0 + $0x128] sm:$0xff]  ;;  %v248_v50 = vsel %vm85_vm0, %v75_v48, 0.0  ;;  %v44_v52 = vld [vmem:[%s1837_s0 + $0xb8] sm:$0xff]  ;;  %v27_v53 = vld [vmem:[%s1837_s0 + $0x30] sm:$0xff] }
  0x1e   :  { %v197_v51 = vsel %vm85_vm0, %v58_v49, 0.0  ;;  %v155_v54 = vsel %vm85_vm0, %v44_v52, 0.0  ;;  %v104_v55 = vsel %vm85_vm0, %v27_v53, 0.0  ;;  %v76_v56 = vld [vmem:[%s1837_s0 + $0x1b8] sm:$0xff]  ;;  %v59_v57 = vld [vmem:[%s1837_s0 + $0x130] sm:$0xff]  ;;  %v45_v60 = vld [vmem:[%s1837_s0 + $0xc0] sm:$0xff] }
  0x1f   :  { %147 = vadd.xlane.f32.xlu1 %v146_v30  ;;  %v251_v58 = vsel %vm85_vm0, %v76_v56, 0.0  ;;  %v200_v59 = vsel %vm85_vm0, %v59_v57, 0.0  ;;  %v28_v61 = vld [vmem:[%s1837_s0 + $0x38] sm:$0xff]  ;;  %v158_v62 = vsel %vm85_vm0, %v45_v60, 0.0  ;;  %v77_v0 = vld [vmem:[%s1837_s0 + $0x1c0] sm:$0xff]  ;;  %v46_v4 = vld [vmem:[%s1837_s0 + $0xc8] sm:$0xff] }
  0x20   :  { %96 = vadd.xlane.f32.xlu0 %v95_v31  ;;  %v107_v63 = vsel %vm85_vm0, %v28_v61, 0.0  ;;  %v60_v1 = vld [vmem:[%s1837_s0 + $0x138] sm:$0xff]  ;;  %v254_v2 = vsel %vm85_vm0, %v77_v0, 0.0  ;;  %v29_v5 = vld [vmem:[%s1837_s0 + $0x40] sm:$0xff]  ;;  %v161_v6 = vsel %vm85_vm0, %v46_v4, 0.0  ;;  %v78_v8 = vld [vmem:[%s1837_s0 + $0x1c8] sm:$0xff] }
  0x21   :  { %v203_v3 = vsel %vm85_vm0, %v60_v1, 0.0  ;;  %v110_v7 = vsel %vm85_vm0, %v29_v5, 0.0  ;;  %v61_v9 = vld [vmem:[%s1837_s0 + $0x140] sm:$0xff]  ;;  %v257_v10 = vsel %vm85_vm0, %v78_v8, 0.0  ;;  %v47_v12 = vld [vmem:[%s1837_s0 + $0xd0] sm:$0xff]  ;;  %v30_v13 = vld [vmem:[%s1837_s0 + $0x48] sm:$0xff] }
  0x22   :  { %v206_v11 = vsel %vm85_vm0, %v61_v9, 0.0  ;;  %v164_v14 = vsel %vm85_vm0, %v47_v12, 0.0  ;;  %v113_v15 = vsel %vm85_vm0, %v30_v13, 0.0  ;;  %v79_v16 = vld [vmem:[%s1837_s0 + $0x1d0] sm:$0xff]  ;;  %v62_v17 = vld [vmem:[%s1837_s0 + $0x148] sm:$0xff]  ;;  %v48_v20 = vld [vmem:[%s1837_s0 + $0xd8] sm:$0xff] }
  0x23   :  { %243 = vadd.xlane.f32.xlu1 %v242_v34  ;;  %v260_v18 = vsel %vm85_vm0, %v79_v16, 0.0  ;;  %v209_v19 = vsel %vm85_vm0, %v62_v17, 0.0  ;;  %v31_v21 = vld [vmem:[%s1837_s0 + $0x50] sm:$0xff]  ;;  %v167_v22 = vsel %vm85_vm0, %v48_v20, 0.0  ;;  %v80_v24 = vld [vmem:[%s1837_s0 + $0x1d8] sm:$0xff]  ;;  %v49_v28 = vld [vmem:[%s1837_s0 + $0xe0] sm:$0xff] }
  0x24   :  { %192 = vadd.xlane.f32.xlu0 %v191_v35  ;;  %v116_v23 = vsel %vm85_vm0, %v31_v21, 0.0  ;;  %v63_v25 = vld [vmem:[%s1837_s0 + $0x150] sm:$0xff]  ;;  %v263_v26 = vsel %vm85_vm0, %v80_v24, 0.0  ;;  %v32_v29 = vld [vmem:[%s1837_s0 + $0x58] sm:$0xff]  ;;  %v170_v30 = vsel %vm85_vm0, %v49_v28, 0.0  ;;  %v81_v32 = vld [vmem:[%s1837_s0 + $0x1e0] sm:$0xff] }
  0x25   :  { %v212_v27 = vsel %vm85_vm0, %v63_v25, 0.0  ;;  %v119_v31 = vsel %vm85_vm0, %v32_v29, 0.0  ;;  %v64_v33 = vld [vmem:[%s1837_s0 + $0x158] sm:$0xff]  ;;  %v266_v34 = vsel %vm85_vm0, %v81_v32, 0.0  ;;  %v50_v36 = vld [vmem:[%s1837_s0 + $0xe8] sm:$0xff]  ;;  %v33_v37 = vld [vmem:[%s1837_s0 + $0x60] sm:$0xff] }
  0x26   :  { %v215_v35 = vsel %vm85_vm0, %v64_v33, 0.0  ;;  %v82_v40 = vld [vmem:[%s1837_s0 + $0x1e8] sm:$0xff]  ;;  %v65_v41 = vld [vmem:[%s1837_s0 + $0x160] sm:$0xff]  ;;  %v51_v44 = vld [vmem:[%s1837_s0 + $0xf0] sm:$0xff]  ;;  %vm463_vm2 = vcmask 195712   ;;  %vm470_vm3 = vcmask 261312  }
  0x27   :  { %150 = vadd.xlane.f32.xlu1 %v149_v38  ;;  %v173_v38 = vsel %vm85_vm0, %v50_v36, 0.0  ;;  %v34_v45 = vld [vmem:[%s1837_s0 + $0x68] sm:$0xff]  ;;  %v83_v48 = vld [vmem:[%s1837_s0 + $0x1f0] sm:$0xff]  ;;  %v52_v52 = vld [vmem:[%s1837_s0 + $0xf8] sm:$0xff]  ;;  %vm477_vm4 = vcmask 326912   ;;  %vm484_vm5 = vcmask 392512  }
  0x28   :  { %99 = vadd.xlane.f32.xlu0 %v98_v39  ;;  %v122_v39 = vsel %vm85_vm0, %v33_v37, 0.0  ;;  %v66_v49 = vld [vmem:[%s1837_s0 + $0x168] sm:$0xff]  ;;  %v358_v53 = vld [vmem:[%s1838_s1 + $0x80] sm:$0xff]  ;;  %v179_v60 = vsel %vm85_vm0, %v52_v52, 0.0  ;;  %v361_v0 = vld [vmem:[%s1838_s1 + $0x98] sm:$0xff]  ;;  %vm491_vm6 = vcmask 458112  }
  0x29   :  { %v342_v57 = vld [vmem:[%s1838_s1] sm:$0xff]  ;;  %v67_v1 = vld [vmem:[%s1837_s0 + $0x170] sm:$0xff]  ;;  %v345_v4 = vld [vmem:[%s1838_s1 + $0x18] sm:$0xff]  ;;  %vm498_vm7 = vcmask 523712   ;;  %vm505_vm8 = vcmask 589312   ;;  %vm512_vm9 = vcmask 654912  }
  0x2a   :  { %v68_v8 = vld [vmem:[%s1837_s0 + $0x178] sm:$0xff]  ;;  %v362_v9 = vld [vmem:[%s1838_s1 + $0xa0] sm:$0xff]  ;;  %v348_v21 = vld [vmem:[%s1838_s1 + $0x30] sm:$0xff]  ;;  %vm519_vm10 = vcmask 720512   ;;  %vm526_vm11 = vcmask 786112   ;;  %vm533_vm12 = vcmask 851712  }
  0x2b   :  { %246 = vadd.xlane.f32.xlu1 %v245_v42  ;;  %v269_v42 = vsel %vm85_vm0, %v82_v40, 0.0  ;;  %v346_v13 = vld [vmem:[%s1838_s1 + $0x20] sm:$0xff]  ;;  %v227_v16 = vsel %vm85_vm0, %v68_v8, 0.0  ;;  %v367_v25 = vld [vmem:[%s1838_s1 + $0xc8] sm:$0xff]  ;;  %v352_v33 = vld [vmem:[%s1838_s1 + $0x50] sm:$0xff]  ;;  %vm540_vm13 = vcmask 917312  }
  0x2c   :  { %195 = vadd.xlane.f32.xlu0 %v194_v43  ;;  %v218_v43 = vsel %vm85_vm0, %v65_v41, 0.0  ;;  %v366_v24 = vld [vmem:[%s1838_s1 + $0xc0] sm:$0xff]  ;;  %v351_v28 = vld [vmem:[%s1838_s1 + $0x48] sm:$0xff]  ;;  %vm547_vm14 = vcmask 982912   ;;  %vm554_vm15 = vcmask 1048512  }
  0x2d   :  { %v370_v36 = vld [vmem:[%s1838_s1 + $0xe0] sm:$0xff]  ;;  %v371_v37 = vld [vmem:[%s1838_s1 + $0xe8] sm:$0xff] }
  0x2e   :  { %v354_v40 = vld [vmem:[%s1838_s1 + $0x60] sm:$0xff]  ;;  %v355_v41 = vld [vmem:[%s1838_s1 + $0x68] sm:$0xff] }
  0x2f   :  { %153 = vadd.xlane.f32.xlu1 %v152_v46  ;;  %v176_v46 = vsel %vm85_vm0, %v51_v44, 0.0  ;;  %v373_v44 = vld [vmem:[%s1838_s1 + $0xf8] sm:$0xff] }
  0x30   :  { %102 = vadd.xlane.f32.xlu0 %v101_v47  ;;  %v125_v47 = vsel %vm85_vm0, %v34_v45, 0.0 }
  0x33   :  { %249 = vadd.xlane.f32.xlu1 %v248_v50  ;;  %v272_v50 = vsel %vm85_vm0, %v83_v48, 0.0  ;;  %v357_v48 = vld [vmem:[%s1838_s1 + $0x78] sm:$0xff] }
  0x34   :  { %198 = vadd.xlane.f32.xlu0 %v197_v51  ;;  %v221_v51 = vsel %vm85_vm0, %v66_v49, 0.0 }
  0x37   :  { %156 = vadd.xlane.f32.xlu1 %v155_v54  ;;  %v359_v54 = vld [vmem:[%s1838_s1 + $0x88] sm:$0xff] }
  0x38   :  { %105 = vadd.xlane.f32.xlu0 %v104_v55  ;;  %v35_v55 = vld [vmem:[%s1837_s0 + $0x70] sm:$0xff]  ;;  %v1066_v56 = vpack.c.bf16 %v359_v54, %v358_v53 }
  0x39   :  { %v128_v61 = vsel %vm85_vm0, %v35_v55, 0.0 }
  0x3a   :  { %1067 = vmatprep.subr.bf16.mxu0 %v1066_v56 }
  0x3b   :  { %252 = vadd.xlane.f32.xlu1 %v251_v58  ;;  %v343_v58 = vld [vmem:[%s1838_s1 + $0x8] sm:$0xff] }
  0x3c   :  { %201 = vadd.xlane.f32.xlu0 %v200_v59  ;;  %v1068_v59 = vpack.c.bf16 %v343_v58, %v342_v57  ;;  %v869_v58 = vld [vmem:[%s1840_s3] sm:$0xff] }
  0x3e   :  { %1069 = vmatpush3.bf16.msra.mxu0 %v1068_v59  ;;  %v870_v59 = vld [vmem:[%s1840_s3 + $0x8] sm:$0xff] }
  0x3f   :  { %159 = vadd.xlane.f32.xlu1 %v158_v62  ;;  %v84_v62 = vld [vmem:[%s1837_s0 + $0x1f8] sm:$0xff] }
  0x40   :  { %108 = vadd.xlane.f32.xlu0 %v107_v63  ;;  %v360_v63 = vld [vmem:[%s1838_s1 + $0x90] sm:$0xff] }
  0x43   :  { %255 = vadd.xlane.f32.xlu1 %v254_v2  ;;  %v1070_v2 = vpack.c.bf16 %v361_v0, %v360_v63  ;;  %v1150_v63 = vmov 0.0|0.0   ;;  %v1099_v0 = vpack.c.bf16 %v870_v59, %v869_v58 }
  0x44   :  { %204 = vadd.xlane.f32.xlu0 %v203_v3  ;;  %v344_v3 = vld [vmem:[%s1838_s1 + $0x10] sm:$0xff]  ;;  %1098 = vmatprep.subr.bf16.mxu1 %v1150_v63 }
  0x45   :  { %v1072_v5 = vpack.c.bf16 %v345_v4, %v344_v3  ;;  %1071 = vmatprep.subr.bf16.mxu0 %v1070_v2  ;;  %1100 = vmatpush3.bf16.msra.mxu1 %v1099_v0 }
  0x46   :  { %1101 = vmatprep.subr.bf16.mxu1 %v1150_v63 }
  0x47   :  { %162 = vadd.xlane.f32.xlu1 %v161_v6  ;;  %v275_v6 = vsel %vm85_vm0, %v84_v62, 0.0  ;;  %1073 = vmatpush3.bf16.msra.mxu0 %v1072_v5 }
  0x48   :  { %111 = vadd.xlane.f32.xlu0 %v110_v7  ;;  %v224_v7 = vsel %vm85_vm0, %v67_v1, 0.0  ;;  %v872_v1 = vld [vmem:[%s1840_s3 + $0x18] sm:$0xff] }
  0x4b   :  { %258 = vadd.xlane.f32.xlu1 %v257_v10  ;;  %v363_v10 = vld [vmem:[%s1838_s1 + $0xa8] sm:$0xff] }
  0x4c   :  { %207 = vadd.xlane.f32.xlu0 %v206_v11  ;;  %v36_v11 = vld [vmem:[%s1837_s0 + $0x78] sm:$0xff]  ;;  %v1074_v12 = vpack.c.bf16 %v363_v10, %v362_v9  ;;  %v873_v10 = vld [vmem:[%s1840_s3 + $0x20] sm:$0xff] }
  0x4d   :  { %v131_v17 = vsel %vm85_vm0, %v36_v11, 0.0  ;;  %v874_v11 = vld [vmem:[%s1840_s3 + $0x28] sm:$0xff]  ;;  %vm793_vm0 = vcmask 1041409  }
  0x4e   :  { %1075 = vmatprep.subr.bf16.mxu0 %v1074_v12 }
  0x4f   :  { %165 = vadd.xlane.f32.xlu1 %v164_v14  ;;  %v347_v14 = vld [vmem:[%s1838_s1 + $0x28] sm:$0xff] }
  0x50   :  { %114 = vadd.xlane.f32.xlu0 %v113_v15  ;;  %v1076_v15 = vpack.c.bf16 %v347_v14, %v346_v13 }
  0x52   :  { %1077 = vmatpush3.bf16.msra.mxu0 %v1076_v15 }
  0x53   :  { %261 = vadd.xlane.f32.xlu1 %v260_v18  ;;  %v364_v18 = vld [vmem:[%s1838_s1 + $0xb0] sm:$0xff] }
  0x54   :  { %210 = vadd.xlane.f32.xlu0 %v209_v19  ;;  %v365_v19 = vld [vmem:[%s1838_s1 + $0xb8] sm:$0xff] }
  0x55   :  { %v1078_v20 = vpack.c.bf16 %v365_v19, %v364_v18  ;;  %v1105_v18 = vpack.c.bf16 %v874_v11, %v873_v10 }
  0x57   :  { %168 = vadd.xlane.f32.xlu1 %v167_v22  ;;  %v349_v22 = vld [vmem:[%s1838_s1 + $0x38] sm:$0xff]  ;;  %1079 = vmatprep.subr.bf16.mxu0 %v1078_v20 }
  0x58   :  { %117 = vadd.xlane.f32.xlu0 %v116_v23  ;;  %v1080_v23 = vpack.c.bf16 %v349_v22, %v348_v21  ;;  %v875_v22 = vld [vmem:[%s1840_s3 + $0x30] sm:$0xff] }
  0x5a   :  { %1081 = vmatpush3.bf16.msra.mxu0 %v1080_v23  ;;  %v876_v23 = vld [vmem:[%s1840_s3 + $0x38] sm:$0xff] }
  0x5b   :  { %264 = vadd.xlane.f32.xlu1 %v263_v26  ;;  %v1082_v26 = vpack.c.bf16 %v367_v25, %v366_v24 }
  0x5c   :  { %213 = vadd.xlane.f32.xlu0 %v212_v27  ;;  %v350_v27 = vld [vmem:[%s1838_s1 + $0x40] sm:$0xff] }
  0x5d   :  { %v1084_v29 = vpack.c.bf16 %v351_v28, %v350_v27  ;;  %1083 = vmatprep.subr.bf16.mxu0 %v1082_v26  ;;  %v1108_v28 = vpack.c.bf16 %v876_v23, %v875_v22 }
  0x5f   :  { %171 = vadd.xlane.f32.xlu1 %v170_v30  ;;  %v368_v30 = vld [vmem:[%s1838_s1 + $0xd0] sm:$0xff]  ;;  %1085 = vmatpush3.bf16.msra.mxu0 %v1084_v29 }
  0x60   :  { %120 = vadd.xlane.f32.xlu0 %v119_v31  ;;  %v369_v31 = vld [vmem:[%s1838_s1 + $0xd8] sm:$0xff] }
  0x61   :  { %v1086_v32 = vpack.c.bf16 %v369_v31, %v368_v30 }
  0x63   :  { %267 = vadd.xlane.f32.xlu1 %v266_v34  ;;  %v353_v34 = vld [vmem:[%s1838_s1 + $0x58] sm:$0xff]  ;;  %1087 = vmatprep.subr.bf16.mxu0 %v1086_v32  ;;  %v877_v32 = vld [vmem:[%s1840_s3 + $0x40] sm:$0xff] }
  0x64   :  { %216 = vadd.xlane.f32.xlu0 %v215_v35  ;;  %v1088_v35 = vpack.c.bf16 %v353_v34, %v352_v33  ;;  %v878_v33 = vld [vmem:[%s1840_s3 + $0x48] sm:$0xff] }
  0x66   :  { %1089 = vmatpush3.bf16.msra.mxu0 %v1088_v35 }
  0x67   :  { %174 = vadd.xlane.f32.xlu1 %v173_v38  ;;  %v445_v38 = vlaneseq }
  0x68   :  { %123 = vadd.xlane.f32.xlu0 %v122_v39  ;;  %v1090_v39 = vpack.c.bf16 %v371_v37, %v370_v36 }
  0x69   :  { %v1530_v45 = vand.u32 127, %v445_v38  ;;  %v1538_v49 = vshrl.u32 %v445_v38, 7 }
  0x6a   :  { %1091 = vmatprep.subr.bf16.mxu0 %v1090_v39  ;;  %v1111_v39 = vpack.c.bf16 %v878_v33, %v877_v32 }
  0x6b   :  { %270 = vadd.xlane.f32.xlu1 %v269_v42  ;;  %v1092_v42 = vpack.c.bf16 %v355_v41, %v354_v40  ;;  %v1543_v54 = vsub.s32 %v1530_v45, %v1538_v49  ;;  %v458_v4 = vadd.s32 4294967280, %v1530_v45  ;;  %v465_v31 = vadd.s32 4294967272, %v1530_v45 }
  0x6c   :  { %219 = vadd.xlane.f32.xlu0 %v218_v43  ;;  %v372_v43 = vld [vmem:[%s1838_s1 + $0xf0] sm:$0xff] }
  0x6d   :  { %1093 = vmatpush3.bf16.msra.mxu0 %v1092_v42  ;;  %v461_v21 = vsub.s32 %v458_v4, %v1538_v49 }
  0x6f   :  { %177 = vadd.xlane.f32.xlu1 %v176_v46  ;;  %v1094_v46 = vpack.c.bf16 %v373_v44, %v372_v43  ;;  %v468_v43 = vsub.s32 %v465_v31, %v1538_v49  ;;  %v879_v44 = vld [vmem:[%s1840_s3 + $0x50] sm:$0xff] }
  0x70   :  { %126 = vadd.xlane.f32.xlu0 %v125_v47  ;;  %v356_v47 = vld [vmem:[%s1838_s1 + $0x70] sm:$0xff] }
  0x71   :  { %1095 = vmatprep.subr.bf16.mxu0 %v1094_v46  ;;  %v880_v46 = vld [vmem:[%s1840_s3 + $0x58] sm:$0xff] }
  0x73   :  { %273 = vadd.xlane.f32.xlu1 %v272_v50  ;;  %v1096_v50 = vpack.c.bf16 %v357_v48, %v356_v47 }
  0x74   :  { %222 = vadd.xlane.f32.xlu0 %v221_v51  ;;  %v451_v51 = vadd.s32 4294967288, %v1530_v45 }
  0x75   :  { %1097 = vmatpush3.bf16.msra.mxu0 %v1096_v50 }
  0x76   :  { %v1546_v57 = vsub.s32 %v451_v51, %v1538_v49 }
  0x77   :  { %180 = vadd.xlane.f32.xlu1 %v179_v60  ;;  %v871_v60 = vld [vmem:[%s1840_s3 + $0x10] sm:$0xff] }
  0x78   :  { %129 = vadd.xlane.f32.xlu0 %v128_v61  ;;  %v1102_v5 = vpack.c.bf16 %v872_v1, %v871_v60 }
  0x7a   :  { %1103 = vmatpush3.bf16.msra.mxu1 %v1102_v5 }
  0x7b   :  { %276 = vadd.xlane.f32.xlu1 %v275_v6  ;;  %1104 = vmatprep.subr.bf16.mxu1 %v1150_v63 }
  0x7c   :  { %225 = vadd.xlane.f32.xlu0 %v224_v7 }
  0x7e   :  { %1106 = vmatpush3.bf16.msra.mxu1 %v1105_v18 }
  0x7f   :  { %228 = vadd.xlane.f32.xlu1 %v227_v16  ;;  %1107 = vmatprep.subr.bf16.mxu1 %v1150_v63 }
  0x80   :  { %132 = vadd.xlane.f32.xlu0 %v131_v17 }
  0x82   :  { %1109 = vmatpush3.bf16.msra.mxu1 %v1108_v28 }
  0x83   :  { %1110 = vmatprep.subr.bf16.mxu1 %v1150_v63 }
  0x86   :  { %1112 = vmatpush3.bf16.msra.mxu1 %v1111_v39 }
  0x87   :  { %1113 = vmatprep.subr.bf16.mxu1 %v1150_v63 }
  0x90   :  { %v232_v52 = vpop.xlane.xlu1 %231 }
  0x91   :  { %v136_v53 = vpop.xlane.xlu0 %135  ;;  %v326_v55 = vmul.f32 0.015625, %v232_v52 }
  0x92   :  { %v294_v56 = vmul.f32 0.015625, %v136_v53 }
  0x93   :  { %v717_v6 = vrot.slane %v326_v55, %v1543_v54 }
  0x94   :  { %v235_v61 = vpop.xlane.xlu1 %234  ;;  %v559_v7 = vrot.slane %v294_v56, %v1543_v54 }
  0x95   :  { %v139_v62 = vpop.xlane.xlu0 %138  ;;  %v327_v2 = vmul.f32 0.015625, %v235_v61 }
  0x96   :  { %v295_v3 = vmul.f32 0.015625, %v139_v62 }
  0x97   :  { %v721_v8 = vrot.slane %v327_v2, %v1546_v57 }
  0x98   :  { %v563_v9 = vrot.slane %v295_v3, %v1546_v57  ;;  %v91_v12 = vpop.xlane.xlu1 %90 }
  0x99   :  { %v88_v13 = vpop.xlane.xlu0 %87  ;;  %v722_v14 = vsel %vm456_vm1, %v721_v8, %v717_v6  ;;  %v279_v16 = vmul.f32 0.015625, %v91_v12  ;;  %v479_v12 = vadd.s32 4294967256, %v1530_v45 }
  0x9a   :  { %v564_v15 = vsel %vm456_vm1, %v563_v9, %v559_v7  ;;  %v278_v17 = vmul.f32 0.015625, %v88_v13 }
  0x9b   :  { %v455_v19 = vrot.slane %v279_v16, %v1546_v57 }
  0x9c   :  { %v450_v20 = vrot.slane %v278_v17, %v1543_v54  ;;  %v184_v24 = vpop.xlane.xlu1 %183 }
  0x9d   :  { %v142_v25 = vpop.xlane.xlu0 %141  ;;  %v310_v29 = vmul.f32 0.015625, %v184_v24 }
  0x9e   :  { %v457_v26 = vsel %vm456_vm1, %v455_v19, %v450_v20  ;;  %v296_v27 = vmul.f32 0.015625, %v142_v25 }
  0x9f   :  { %v638_v40 = vrot.slane %v310_v29, %v1543_v54  ;;  %v1114_v54 = vpack.c.bf16 %v880_v46, %v879_v44 }
  0xa0   :  { %v568_v30 = vrot.slane %v296_v27, %v461_v21  ;;  %v238_v34 = vpop.xlane.xlu1 %237 }
  0xa1   :  { %v187_v35 = vpop.xlane.xlu0 %186  ;;  %v328_v37 = vmul.f32 0.015625, %v238_v34  ;;  %1115 = vmatpush3.bf16.msra.mxu1 %v1114_v54 }
  0xa2   :  { %v569_v36 = vsel %vm463_vm2, %v568_v30, %v564_v15  ;;  %v311_v38 = vmul.f32 0.015625, %v187_v35  ;;  %1116 = vmatprep.subr.bf16.mxu1 %v1150_v63  ;;  %v486_v30 = vadd.s32 4294967248, %v1530_v45 }
  0xa3   :  { %v726_v41 = vrot.slane %v328_v37, %v461_v21 }
  0xa4   :  { %v642_v42 = vrot.slane %v311_v38, %v1546_v57  ;;  %v145_v47 = vpop.xlane.xlu1 %144  ;;  %v472_v57 = vadd.s32 4294967264, %v1530_v45  ;;  %v1625_v39 = vsub.s32 %v486_v30, %v1538_v49 }
  0xa5   :  { %v94_v48 = vpop.xlane.xlu0 %93  ;;  %v727_v50 = vsel %vm463_vm2, %v726_v41, %v722_v14  ;;  %v297_v52 = vmul.f32 0.015625, %v145_v47 }
  0xa6   :  { %v643_v51 = vsel %vm456_vm1, %v642_v42, %v638_v40  ;;  %v280_v53 = vmul.f32 0.015625, %v94_v48  ;;  %v475_v3 = vsub.s32 %v472_v57, %v1538_v49  ;;  %vm1151_vm1 = vmmov 0  }
  0xa7   :  { %v573_v55 = vrot.slane %v297_v52, %v468_v43 }
  0xa8   :  { %v462_v56 = vrot.slane %v280_v53, %v461_v21  ;;  %v241_v58 = vpop.xlane.xlu1 %240 }
  0xa9   :  { %v190_v59 = vpop.xlane.xlu0 %189  ;;  %v574_v60 = vsel %vm470_vm3, %v573_v55, %v569_v36  ;;  %v329_v62 = vmul.f32 0.015625, %v241_v58 }
  0xaa   :  { %v464_v61 = vsel %vm463_vm2, %v462_v56, %v457_v26  ;;  %v312_v0 = vmul.f32 0.015625, %v190_v59 }
  0xab   :  { %v731_v1 = vrot.slane %v329_v62, %v468_v43 }
  0xac   :  { %v647_v2 = vrot.slane %v312_v0, %v461_v21  ;;  %v148_v4 = vpop.xlane.xlu1 %147  ;;  %v482_v21 = vsub.s32 %v479_v12, %v1538_v49 }
  0xad   :  { %v97_v5 = vpop.xlane.xlu0 %96  ;;  %v732_v6 = vsel %vm470_vm3, %v731_v1, %v727_v50  ;;  %v298_v8 = vmul.f32 0.015625, %v148_v4 }
  0xae   :  { %v648_v7 = vsel %vm463_vm2, %v647_v2, %v643_v51  ;;  %v281_v9 = vmul.f32 0.015625, %v97_v5 }
  0xaf   :  { %v578_v10 = vrot.slane %v298_v8, %v475_v3 }
  0xb0   :  { %v469_v11 = vrot.slane %v281_v9, %v468_v43  ;;  %v244_v13 = vpop.xlane.xlu1 %243 }
  0xb1   :  { %v193_v14 = vpop.xlane.xlu0 %192  ;;  %v579_v15 = vsel %vm477_vm4, %v578_v10, %v574_v60  ;;  %v330_v17 = vmul.f32 0.015625, %v244_v13 }
  0xb2   :  { %v471_v16 = vsel %vm470_vm3, %v469_v11, %v464_v61  ;;  %v313_v18 = vmul.f32 0.015625, %v193_v14  ;;  %v493_v14 = vadd.s32 4294967240, %v1530_v45 }
  0xb3   :  { %v736_v19 = vrot.slane %v330_v17, %v475_v3  ;;  %v500_v17 = vadd.s32 4294967232, %v1530_v45 }
  0xb4   :  { %v652_v20 = vrot.slane %v313_v18, %v468_v43  ;;  %v151_v22 = vpop.xlane.xlu1 %150  ;;  %v507_v18 = vadd.s32 4294967224, %v1530_v45 }
  0xb5   :  { %v100_v23 = vpop.xlane.xlu0 %99  ;;  %v737_v24 = vsel %vm477_vm4, %v736_v19, %v732_v6  ;;  %v299_v26 = vmul.f32 0.015625, %v151_v22  ;;  %v514_v22 = vadd.s32 4294967216, %v1530_v45  ;;  %v1675_v30 = vsub.s32 %v500_v17, %v1538_v49 }
  0xb6   :  { %v653_v25 = vsel %vm470_vm3, %v652_v20, %v648_v7  ;;  %v282_v27 = vmul.f32 0.015625, %v100_v23  ;;  %v1665_v20 = vsub.s32 %v493_v14, %v1538_v49 }
  0xb7   :  { %v583_v28 = vrot.slane %v299_v26, %v482_v21 }
  0xb8   :  { %v476_v29 = vrot.slane %v282_v27, %v475_v3  ;;  %v247_v31 = vpop.xlane.xlu1 %246 }
  0xb9   :  { %v196_v32 = vpop.xlane.xlu0 %195  ;;  %v584_v33 = vsel %vm484_vm5, %v583_v28, %v579_v15  ;;  %v331_v35 = vmul.f32 0.015625, %v247_v31  ;;  %v535_v31 = vadd.s32 4294967192, %v1530_v45 }
  0xba   :  { %v478_v34 = vsel %vm477_vm4, %v476_v29, %v471_v16  ;;  %v314_v36 = vmul.f32 0.015625, %v196_v32  ;;  %v1679_v32 = vsub.s32 %v507_v18, %v1538_v49 }
  0xbb   :  { %v741_v37 = vrot.slane %v331_v35, %v482_v21 }
  0xbc   :  { %v657_v38 = vrot.slane %v314_v36, %v475_v3  ;;  %v154_v40 = vpop.xlane.xlu1 %153 }
  0xbd   :  { %v103_v41 = vpop.xlane.xlu0 %102  ;;  %v1628_v42 = vsel %vm484_vm5, %v741_v37, %v737_v24  ;;  %v300_v44 = vmul.f32 0.015625, %v154_v40  ;;  %v521_v24 = vadd.s32 4294967208, %v1530_v45 }
  0xbe   :  { %v658_v43 = vsel %vm477_vm4, %v657_v38, %v653_v25  ;;  %v283_v46 = vmul.f32 0.015625, %v103_v41  ;;  %v528_v25 = vadd.s32 4294967200, %v1530_v45  ;;  %v1686_v38 = vsub.s32 %v514_v22, %v1538_v49 }
  0xbf   :  { %v588_v47 = vrot.slane %v300_v44, %v1625_v39 }
  0xc0   :  { %v483_v48 = vrot.slane %v283_v46, %v482_v21  ;;  %v250_v50 = vpop.xlane.xlu1 %249  ;;  %v1693_v44 = vsub.s32 %v528_v25, %v1538_v49 }
  0xc1   :  { %v199_v51 = vpop.xlane.xlu0 %198  ;;  %v1633_v52 = vsel %vm491_vm6, %v588_v47, %v584_v33  ;;  %v332_v19 = vmul.f32 0.015625, %v250_v50  ;;  %v542_v33 = vadd.s32 4294967184, %v1530_v45 }
  0xc2   :  { %v1636_v53 = vsel %vm484_vm5, %v483_v48, %v478_v34  ;;  %v315_v54 = vmul.f32 0.015625, %v199_v51  ;;  %v549_v34 = vadd.s32 4294967176, %v1530_v45  ;;  %v1702_v51 = vsub.s32 %v535_v31, %v1538_v49 }
  0xc3   :  { %v746_v35 = vrot.slane %v332_v19, %v1625_v39 }
  0xc4   :  { %v662_v55 = vrot.slane %v315_v54, %v482_v21  ;;  %v157_v56 = vpop.xlane.xlu1 %156 }
  0xc5   :  { %v106_v57 = vpop.xlane.xlu0 %105  ;;  %v301_v21 = vmul.f32 0.015625, %v157_v56  ;;  %v1705_v56 = vsub.s32 %v542_v33, %v1538_v49 }
  0xc6   :  { %v1639_v58 = vsel %vm484_vm5, %v662_v55, %v658_v43  ;;  %v284_v23 = vmul.f32 0.015625, %v106_v57  ;;  %v1690_v43 = vsub.s32 %v521_v24, %v1538_v49  ;;  %v1708_v57 = vsub.s32 %v549_v34, %v1538_v49 }
  0xc7   :  { %v593_v36 = vrot.slane %v301_v21, %v1665_v20 }
  0xc8   :  { %v253_v59 = vpop.xlane.xlu1 %252  ;;  %v490_v40 = vrot.slane %v284_v23, %v1625_v39 }
  0xc9   :  { %v202_v60 = vpop.xlane.xlu0 %201  ;;  %v333_v28 = vmul.f32 0.015625, %v253_v59  ;;  %v747_v59 = vsel %vm491_vm6, %v746_v35, %v1628_v42 }
  0xca   :  { %v316_v29 = vmul.f32 0.015625, %v202_v60  ;;  %v594_v60 = vsel %vm498_vm7, %v593_v36, %v1633_v52 }
  0xcb   :  { %v751_v47 = vrot.slane %v333_v28, %v1665_v20 }
  0xcc   :  { %v160_v61 = vpop.xlane.xlu1 %159  ;;  %v667_v48 = vrot.slane %v316_v29, %v1625_v39 }
  0xcd   :  { %v109_v62 = vpop.xlane.xlu0 %108  ;;  %v302_v37 = vmul.f32 0.015625, %v160_v61  ;;  %v752_v17 = vsel %vm498_vm7, %v751_v47, %v747_v59 }
  0xce   :  { %v285_v41 = vmul.f32 0.015625, %v109_v62  ;;  %v492_v62 = vsel %vm491_vm6, %v490_v40, %v1636_v53  ;;  %v668_v42 = vsel %vm491_vm6, %v667_v48, %v1639_v58 }
  0xcf   :  { %v598_v39 = vrot.slane %v302_v37, %v1675_v30 }
  0xd0   :  { %v256_v0 = vpop.xlane.xlu1 %255 }
  0xd1   :  { %v205_v1 = vpop.xlane.xlu0 %204  ;;  %v334_v50 = vmul.f32 0.015625, %v256_v0  ;;  %v497_v0 = vrot.slane %v285_v41, %v1665_v20  ;;  %v599_v19 = vsel %vm505_vm8, %v598_v39, %v594_v60 }
  0xd2   :  { %v317_v54 = vmul.f32 0.015625, %v205_v1 }
  0xd3   :  { %v756_v52 = vrot.slane %v334_v50, %v1675_v30  ;;  %v499_v23 = vsel %vm498_vm7, %v497_v0, %v492_v62 }
  0xd4   :  { %v163_v2 = vpop.xlane.xlu1 %162  ;;  %v672_v18 = vrot.slane %v317_v54, %v1665_v20 }
  0xd5   :  { %v112_v3 = vpop.xlane.xlu0 %111  ;;  %v303_v55 = vmul.f32 0.015625, %v163_v2 }
  0xd6   :  { %v286_v61 = vmul.f32 0.015625, %v112_v3 }
  0xd7   :  { %v603_v53 = vrot.slane %v303_v55, %v1679_v32 }
  0xd8   :  { %v259_v4 = vpop.xlane.xlu1 %258  ;;  %v504_v21 = vrot.slane %v286_v61, %v1675_v30 }
  0xd9   :  { %v208_v5 = vpop.xlane.xlu0 %207  ;;  %v335_v1 = vmul.f32 0.015625, %v259_v4  ;;  %v604_v31 = vsel %vm512_vm9, %v603_v53, %v599_v19 }
  0xda   :  { %v318_v2 = vmul.f32 0.015625, %v208_v5 }
  0xdc   :  { %v1641_v6 = vpop.xlane.xlu1 %165  ;;  %v677_v20 = vrot.slane %v318_v2, %v1675_v30 }
  0xdd   :  { %v1643_v7 = vpop.xlane.xlu0 %114  ;;  %v304_v3 = vmul.f32 0.015625, %v1641_v6  ;;  %v761_v6 = vrot.slane %v335_v1, %v1679_v32 }
  0xde   :  { %v287_v4 = vmul.f32 0.015625, %v1643_v7 }
  0xdf   :  { %v608_v28 = vrot.slane %v304_v3, %v1686_v38 }
  0xe0   :  { %v1645_v8 = vpop.xlane.xlu1 %261  ;;  %v511_v33 = vrot.slane %v287_v4, %v1679_v32 }
  0xe1   :  { %v1647_v9 = vpop.xlane.xlu0 %210  ;;  %v336_v5 = vmul.f32 0.015625, %v1645_v8  ;;  %v757_v8 = vsel %vm505_vm8, %v756_v52, %v752_v17  ;;  %v609_v48 = vsel %vm519_vm10, %v608_v28, %v604_v31 }
  0xe2   :  { %v319_v22 = vmul.f32 0.015625, %v1647_v9 }
  0xe3   :  { %v766_v30 = vrot.slane %v336_v5, %v1686_v38 }
  0xe4   :  { %v1649_v10 = vpop.xlane.xlu1 %168  ;;  %v682_v34 = vrot.slane %v319_v22, %v1679_v32 }
  0xe5   :  { %v1651_v11 = vpop.xlane.xlu0 %117  ;;  %v305_v58 = vmul.f32 0.015625, %v1649_v10  ;;  %v673_v10 = vsel %vm498_vm7, %v672_v18, %v668_v42 }
  0xe6   :  { %v288_v24 = vmul.f32 0.015625, %v1651_v11  ;;  %v506_v11 = vsel %vm505_vm8, %v504_v21, %v499_v23 }
  0xe7   :  { %v613_v35 = vrot.slane %v305_v58, %v1690_v43 }
  0xe8   :  { %v1653_v12 = vpop.xlane.xlu1 %264  ;;  %v518_v37 = vrot.slane %v288_v24, %v1686_v38 }
  0xe9   :  { %v1655_v13 = vpop.xlane.xlu0 %213  ;;  %v337_v29 = vmul.f32 0.015625, %v1653_v12  ;;  %v762_v12 = vsel %vm512_vm9, %v761_v6, %v757_v8  ;;  %v614_v39 = vsel %vm526_vm11, %v613_v35, %v609_v48 }
  0xea   :  { %v320_v9 = vmul.f32 0.015625, %v1655_v13  ;;  %v678_v13 = vsel %vm505_vm8, %v677_v20, %v673_v10  ;;  %v767_v55 = vsel %vm519_vm10, %v766_v30, %v762_v12 }
  0xeb   :  { %v771_v50 = vrot.slane %v337_v29, %v1690_v43 }
  0xec   :  { %v1658_v15 = vpop.xlane.xlu1 %171  ;;  %v687_v32 = vrot.slane %v320_v9, %v1686_v38 }
  0xed   :  { %v1660_v16 = vpop.xlane.xlu0 %120  ;;  %v306_v36 = vmul.f32 0.015625, %v1658_v15  ;;  %v513_v15 = vsel %vm512_vm9, %v511_v33, %v506_v11 }
  0xee   :  { %v289_v40 = vmul.f32 0.015625, %v1660_v16  ;;  %v683_v16 = vsel %vm512_vm9, %v682_v34, %v678_v13 }
  0xef   :  { %v618_v61 = vrot.slane %v306_v36, %v1693_v44 }
  0xf0   :  { %v1670_v26 = vpop.xlane.xlu1 %267  ;;  %v525_v38 = vrot.slane %v289_v40, %v1690_v43 }
  0xf1   :  { %v1672_v27 = vpop.xlane.xlu0 %216  ;;  %v338_v54 = vmul.f32 0.015625, %v1670_v26  ;;  %v520_v26 = vsel %vm519_vm10, %v518_v37, %v513_v15  ;;  %v619_v4 = vsel %vm533_vm12, %v618_v61, %v614_v39  ;;  %v883_v61 = vld [vmem:[%s1840_s3 + $0x70] sm:$0xff] }
  0xf2   :  { %v321_v59 = vmul.f32 0.015625, %v1672_v27  ;;  %v772_v27 = vsel %vm526_vm11, %v771_v50, %v767_v55  ;;  %v527_v22 = vsel %vm526_vm11, %v525_v38, %v520_v26  ;;  %v1152_v38 = vmov 0.0  }
  0xf3   :  { %v776_v42 = vrot.slane %v338_v54, %v1693_v44  ;;  %1063 = vmatprep.mubr.msk.f32.mxu1 %vm1151_vm1, %v1152_v38 }
  0xf4   :  { %v1695_v46 = vpop.xlane.xlu1 %174  ;;  %v692_v3 = vrot.slane %v321_v59, %v1690_v43 }
  0xf5   :  { %v1697_v45 = vpop.xlane.xlu0 %123  ;;  %v307_v60 = vmul.f32 0.015625, %v1695_v46  ;;  %v688_v46 = vsel %vm519_vm10, %v687_v32, %v683_v16  ;;  %v777_v24 = vsel %vm533_vm12, %v776_v42, %v772_v27  ;;  %v881_v16 = vld [vmem:[%s1840_s3 + $0x60] sm:$0xff] }
  0xf6   :  { %v290_v18 = vmul.f32 0.015625, %v1697_v45  ;;  %v693_v8 = vsel %vm526_vm11, %v692_v3, %v688_v46  ;;  %v978_v46 = vld [vmem:[%s1841_s4] ss:$0 sm:$0xff] }
  0xf8   :  { %v271_v14 = vpop.xlane.xlu1 %270 }
  0xf9   :  { %v1718_v49 = vpop.xlane.xlu0 %219  ;;  %v339_v62 = vmul.f32 0.015625, %v271_v14  ;;  %v623_v14 = vrot.slane %v307_v60, %v1702_v51 }
  0xfa   :  { %v322_v53 = vmul.f32 0.015625, %v1718_v49 }
  0xfb   :  { %v781_v5 = vrot.slane %v339_v62, %v1702_v51  ;;  %v624_v29 = vsel %vm540_vm13, %v623_v14, %v619_v4  ;;  %v884_v62 = vld [vmem:[%s1840_s3 + $0x78] sm:$0xff] }
  0xfc   :  { %v178_v7 = vpop.xlane.xlu1 %177  ;;  %v697_v28 = vrot.slane %v322_v53, %v1693_v44  ;;  %v1120_v26 = vpack.c.bf16 %v884_v62, %v883_v61 }
  0xfd   :  { %v127_v25 = vpop.xlane.xlu0 %126  ;;  %v308_v0 = vmul.f32 0.015625, %v178_v7  ;;  %v782_v33 = vsel %vm540_vm13, %v781_v5, %v777_v24 }
  0xfe   :  { %v291_v19 = vmul.f32 0.015625, %v127_v25  ;;  %v532_v25 = vrot.slane %v290_v18, %v1693_v44 }
  0xff   :  { %v628_v58 = vrot.slane %v308_v0, %v1705_v56 }
 0x100   :  { %v274_v41 = vpop.xlane.xlu1 %273  ;;  %v539_v9 = vrot.slane %v291_v19, %v1702_v51  ;;  %v534_v40 = vsel %vm533_vm12, %v532_v25, %v527_v22 }
 0x101   :  { %v223_v47 = vpop.xlane.xlu0 %222  ;;  %v340_v1 = vmul.f32 0.015625, %v274_v41  ;;  %v629_v36 = vsel %vm547_vm14, %v628_v58, %v624_v29  ;;  %v698_v41 = vsel %vm533_vm12, %v697_v28, %v693_v8 }
 0x102   :  { %v323_v21 = vmul.f32 0.015625, %v223_v47 }
 0x103   :  { %v786_v23 = vrot.slane %v340_v1, %v1705_v56  ;;  %v977_v1 = vld [vmem:[%s1839_s2] ss:$0 sm:$0xff] }
 0x104   :  { %v181_v2 = vpop.xlane.xlu1 %180  ;;  %v702_v10 = vrot.slane %v323_v21, %v1702_v51 }
 0x105   :  { %v130_v17 = vpop.xlane.xlu0 %129  ;;  %v309_v52 = vmul.f32 0.015625, %v181_v2  ;;  %v787_v44 = vsel %vm547_vm14, %v786_v23, %v782_v33 }
 0x106   :  { %v292_v6 = vmul.f32 0.015625, %v130_v17  ;;  %v703_v48 = vsel %vm540_vm13, %v702_v10, %v698_v41 }
 0x107   :  { %v633_v45 = vrot.slane %v309_v52, %v1708_v57 }
 0x108   :  { %v277_v43 = vpop.xlane.xlu1 %276  ;;  %v546_v30 = vrot.slane %v292_v6, %v1705_v56 }
 0x109   :  { %v226_v20 = vpop.xlane.xlu0 %225  ;;  %v341_v49 = vmul.f32 0.015625, %v277_v43  ;;  %v634_v37 = vsel %vm554_vm15, %v633_v45, %v629_v36 }
 0x10a   :  { %v324_v7 = vmul.f32 0.015625, %v226_v20 }
 0x10b   :  { %v791_v31 = vrot.slane %v341_v49, %v1708_v57 }
 0x10c   :  { %v707_v11 = vrot.slane %v324_v7, %v1705_v56  ;;  %v229_v34 = vpop.xlane.xlu1 %228  ;;  %v541_v56 = vsel %vm540_vm13, %v539_v9, %v534_v40 }
 0x10d   :  { %v133_v35 = vpop.xlane.xlu0 %132  ;;  %v325_v12 = vmul.f32 0.015625, %v229_v34  ;;  %v792_v51 = vsel %vm554_vm15, %v791_v31, %v787_v44  ;;  %v548_v54 = vsel %vm547_vm14, %v546_v30, %v541_v56 }
 0x10e   :  { %v293_v13 = vmul.f32 0.015625, %v133_v35  ;;  %v795_v47 = vsel %vm793_vm0, %v792_v51, %v634_v37  ;;  %v708_v15 = vsel %vm547_vm14, %v707_v11, %v703_v48 }
 0x10f   :  { %v712_v50 = vrot.slane %v325_v12, %v1708_v57  ;;  %862 = vmatprep.mubr.f32.mxu0 %v795_v47 }
 0x110   :  { %v553_v32 = vrot.slane %v293_v13, %v1708_v57  ;;  %v882_v57 = vld [vmem:[%s1840_s3 + $0x68] sm:$0xff]  ;;  %s1153_s3 = smov [#allocation2]  }
 0x111   :  { %v713_v59 = vsel %vm554_vm15, %v712_v50, %v708_v15  ;;  %v1117_v39 = vpack.c.bf16 %v882_v57, %v881_v16  ;;  %s969_s16 = sshll.u32 %s1153_s3, 4  ;;  %s970_s16 = int_to_ptr.vmem [resolvable:$true] %s969_s16 }
 0x112   :  { %v555_v55 = vsel %vm554_vm15, %v553_v32, %v548_v54  ;;  %s1126_s17 = scalar_lea.vmem %s970_s16, 32  ;;  %p1131_p1 = scmp.lt.s32.totalorder %s970_s16, %s970_s16 }
 0x113   :  { %v794_v60 = vsel %vm793_vm0, %v713_v59, %v555_v55  ;;  %1118 = vmatpush3.bf16.msra.mxu1 %v1117_v39  ;;  %p1127_p0 = scmp.ne.s32.totalorder %s970_s16, %s1126_s17  ;;  %p1132_p2 = scmp.lt.s32.totalorder %s1126_s17, %s1126_s17 }
 0x114   :  { %863 = vmatmul.mubr.f32.vlgmr.msra.gmra.mrb[0].mxu0 %v794_v60  ;;  %1119 = vmatprep.subr.bf16.mxu1 %v1150_v63 }
 0x115   :  { %p1133_p3 = por %p1132_p2, %p1131_p1 }
 0x117   :  { %1121 = vmatpush3.bf16.msra.mxu1 %v1120_v26  ;;  %p1134_p4 = pnand %p1133_p3, %p1127_p0 }
 0x1e7   :  { %v1011_v0 = vpop.f32.mrb[0].mxu0 }
 0x1e8   :  { %v1012_v2 = vpop.f32.mrb[1].mxu0 }
 0x1e9   :  { %v1013_v63 = vadd.f32 %v1012_v2, %v1011_v0 }
 0x1eb   :  { %v865_v17 = vadd.f32 %v1013_v63, %v977_v1 }
 0x1ed   :  { %v868_v27 = vmax.f32 %v865_v17, 0.0 }
 0x1ef   :  { %1064 = vmatmul.mubr.f32.vlgmr.msra.gmra.mrb[0].mxu1 %v868_v27 }
 0x2c2   :  { %v958_v42 = vpop.f32.mrb[0].mxu1 }
 0x2c3   :  { %v959_v52 = vadd.f32 %v978_v46, %v958_v42  ;;  %v1065_v3 = vpop.f32.mrb[1].mxu1 }
 0x2c5   :  { %962 = vst [vmem:[#allocation2] sm:$0x3] %v959_v52 }
 0x2c6   :  { %1137 = shalt.err (!%p1134_p4)
}
 0x2c7   :  { %s1138_s19 = scalar_lea.hbm %s1842_s5, 32 }
 0x2c8   :  { %p1139_p5 = scmp.ne.s32.totalorder %s1842_s5, %s1138_s19  ;;  %p1142_p6 = scmp.lt.u32.totalorder %s1138_s19, %s1842_s5 }
 0x2ca   :  { %p1144_p7 = pnand %p1142_p6, %p1139_p5 }
 0x2cc   :  { %1147 = shalt.err (!%p1144_p7)
}
 0x2cd   :  { %972 = dma.vmem_to_hbm [thread:$0]  %s970_s16, 32, %s1842_s5, [#allocation3]  }
 0x2ce   :  { %1148 = dma.done.wait [#allocation3], 32  }
 0x2cf   :  { %1149 = vsyncadd [#allocation3], 4294967264 }
 0x2d0   :  { %976 = vsyncpa [#allocation3], 1 }

</bundles_post_ra>
